<compile_context>
chip_gen: v6e
topology: v6e:2x2x1
jax: 0.10.0
libtpu: 0.0.40
codegen_flags: <defaults>
</compile_context>

<pallas_src>
import functools

import jax
import jax.numpy as jnp
from jax.experimental import pallas as pl
from jax.experimental.pallas import tpu as pltpu


def scam_kernel(xl_ref, xr_ref, tb_ref, w_ref, b_ref, ol_ref, or_ref,
                *, eps, th, wpx, cdt):
    c = xl_ref.shape[1]
    n = th * wpx

    # (1, C, N) native-NCHW block -> (N, C) working layout (in-VMEM transpose,
    # done in f32 — the proven path).
    xl = jnp.transpose(xl_ref[0].astype(jnp.float32))    # (N, C)
    xr = jnp.transpose(xr_ref[0].astype(jnp.float32))    # (N, C)

    def layernorm(x):
        # LayerNorm2d core; the affine (w, b) is pre-folded into the projection.
        mu = jnp.mean(x, axis=-1, keepdims=True)
        var = jnp.mean((x - mu) ** 2, axis=-1, keepdims=True)
        return (x - mu) * jax.lax.rsqrt(var + eps)

    nl = layernorm(xl)
    nr = layernorm(xr)

    biases = b_ref[...].astype(jnp.float32)               # (4, C), resident

    def proj(x, i):
        # (N, C) @ (C, C) on the MXU, f32 accumulation, ONE cast to the MXU
        # compute dtype for the attention einsums (no per-einsum recasts).
        y = jnp.dot(x.astype(cdt), w_ref[i], preferred_element_type=jnp.float32)
        y = y + biases[i:i + 1]
        return y.reshape(th, wpx, c).astype(cdt)

    q_l = proj(nl, 0)   # LN-l affine and 1/sqrt(C) scale pre-folded
    q_r = proj(nr, 1)   # LN-r affine pre-folded
    v_l = proj(xl, 2)   # gamma pre-folded
    v_r = proj(xr, 3)   # beta pre-folded

    # Per-row W x W cross-attention, batched over the TH rows of this slab.
    attn = jnp.einsum("rwc,rvc->rwv", q_l, q_r,
                      preferred_element_type=jnp.float32)       # (TH, Wl, Wr)
    # The l2r attention is exactly the r2l one with the two pixel axes swapped:
    # an XLU transpose instead of a second QK^T MXU pass.
    attn_t = jnp.swapaxes(attn, 1, 2)                           # (TH, Wr, Wl)

    def softmax_last(a):
        m = jnp.max(a, axis=-1, keepdims=True)
        e = jnp.exp(a - m)
        return e * pl.reciprocal(jnp.sum(e, axis=-1, keepdims=True), approx=True)

    f_r2l = jnp.einsum("rwv,rvc->rwc", softmax_last(attn).astype(cdt), v_r,
                       preferred_element_type=jnp.float32).reshape(n, c)
    f_l2r = jnp.einsum("rwv,rvc->rwc", softmax_last(attn_t).astype(cdt), v_l,
                       preferred_element_type=jnp.float32).reshape(n, c)

    tb = tb_ref[0].astype(jnp.float32)                     # (1, C) time bias

    # Residual add, transpose back to native (C, N) storage, cast, store.
    ol_ref[0] = jnp.transpose(xl + f_r2l + tb).astype(ol_ref.dtype)
    or_ref[0] = jnp.transpose(xr + f_l2r + tb).astype(or_ref.dtype)


def _vmem_capacity_bytes():
    """Physical VMEM of the current chip; v7x-safe fallback if the query fails."""
    try:
        cap = getattr(pltpu.get_tpu_info(), "vmem_capacity_bytes", None)
        if cap:
            return int(cap)
    except Exception:
        pass
    return 64 << 20


def _per_step_vmem_bytes(th, w, c, io_isz, w_isz):
    """Conservative total VMEM footprint of one grid step with TH rows."""
    n = th * w
    io = 4 * 2 * n * c * io_isz                  # xl/xr/ol/or slabs, double-buffered
    consts = 2 * (4 * c * c * w_isz + 4 * c * 4 + c * 4)   # weight/bias/time packs
    work = 10 * n * c * 4                        # x/norm/q/v/f f32-class intermediates
    attn = 4 * th * w * w * 4                    # attn, attn^T, exp/softmax temps
    return io + consts + work + attn


def _choose_rows_per_step(h, w, c, io_isz, w_isz, budget_bytes, batch):
    """Rows per grid step (TH).

    Largest TH that (a) divides H, (b) keeps the lane dim TH*W 128-aligned (or
    covers the whole image — the only other legal block shape), and (c) whose
    TOTAL per-step footprint fits the budget.  Falls back to the smallest
    legal slab (never blindly to TH=H), and keeps the grid product >= 2 so
    both v7x TensorCores get work.
    """
    cands = [th for th in range(1, h + 1)
             if h % th == 0 and ((th * w) % 128 == 0 or th == h)]
    fitting = [th for th in cands
               if _per_step_vmem_bytes(th, w, c, io_isz, w_isz) <= budget_bytes]
    if not fitting:
        # No legal slab fits the budget (e.g. prime H with unaligned W): take
        # the smallest legal one and rely on the vmem_limit headroom.
        return min(cands)
    th = max(fitting)
    if batch * (h // th) < 2:                    # avoid a degenerate 1-step grid
        smaller = [x for x in fitting if x < th]
        if smaller:
            th = max(smaller)
    return th


def scam_forward(t, x_l, x_r, params, *, eps=1e-6, compute_dtype=jnp.bfloat16):
    """SCAM forward.  t: (B, T_emb); x_l / x_r: (B, C, H, W) (PyTorch NCHW).

    Storage dtype passes through: feed bf16 activations to halve HBM traffic
    on this memory-bound op (the kernel upcasts and accumulates in f32).
    """
    b, c, h, w = x_l.shape
    scale = float(c) ** (-0.5)

    io_isz = jnp.dtype(x_l.dtype).itemsize
    w_isz = jnp.dtype(compute_dtype).itemsize

    # Explicit scoped-VMEM limit (defaults are only 16-32 MiB): ~46 MiB on
    # v7x (64 MiB physical), ~92 MiB on v5e/v6e (128 MiB physical).
    vmem_limit = int(_vmem_capacity_bytes() * 0.72)
    th = _choose_rows_per_step(h, w, c, io_isz, w_isz,
                               budget_bytes=int(vmem_limit * 0.80), batch=b)
    n = th * w

    # time_mlp = Linear(Mish(t)) — tiny (B, T_emb) op, computed as wrapper glue.
    tm = t * jnp.tanh(jax.nn.softplus(t))
    tbias = (tm @ params["time_w"].T + params["time_b"]).reshape(b, 1, c)
    tbias = tbias.astype(jnp.float32)

    # 1x1-conv weights (C_out, C_in, 1, 1) -> (C_in, C_out), with LayerNorm
    # affines, attention scale and beta/gamma folded in, packed into 2 tensors.
    def conv_w(wt):
        return jnp.transpose(wt[:, :, 0, 0], (1, 0))

    w_l1, w_r1 = conv_w(params["wl1"]), conv_w(params["wr1"])
    w_l2, w_r2 = conv_w(params["wl2"]), conv_w(params["wr2"])

    wq_l = (params["lnl_w"][:, None] * w_l1) * scale
    bq_l = (params["lnl_b"] @ w_l1 + params["bl1"]) * scale
    wq_r = params["lnr_w"][:, None] * w_r1
    bq_r = params["lnr_b"] @ w_r1 + params["br1"]
    wv_l = w_l2 * params["gamma"][None, :]
    bv_l = params["bl2"] * params["gamma"]
    wv_r = w_r2 * params["beta"][None, :]
    bv_r = params["br2"] * params["beta"]

    w_pack = jnp.stack([wq_l, wq_r, wv_l, wv_r]).astype(compute_dtype)   # (4, C, C)
    b_pack = jnp.stack([bq_l, bq_r, bv_l, bv_r]).astype(jnp.float32)     # (4, C)

    # Native NCHW storage, spatially flattened (contiguous, free reshape).
    xl2 = x_l.reshape(b, c, h * w)
    xr2 = x_r.reshape(b, c, h * w)

    slab = pl.BlockSpec((1, c, n), lambda bi, hi: (bi, 0, hi))
    tspec = pl.BlockSpec((1, 1, c), lambda bi, hi: (bi, 0, 0))
    wspec = pl.BlockSpec((4, c, c), lambda bi, hi: (0, 0, 0))   # resident constants
    bspec = pl.BlockSpec((4, c), lambda bi, hi: (0, 0))

    kernel = functools.partial(scam_kernel, eps=eps, th=th, wpx=w, cdt=compute_dtype)

    out_l, out_r = pl.pallas_call(
        kernel,
        out_shape=(jax.ShapeDtypeStruct((b, c, h * w), x_l.dtype),
                   jax.ShapeDtypeStruct((b, c, h * w), x_r.dtype)),
        grid_spec=pltpu.PrefetchScalarGridSpec(
            num_scalar_prefetch=0,
            grid=(b, h // th),
            in_specs=[slab, slab, tspec, wspec, bspec],
            out_specs=[slab, slab],
        ),
        compiler_params=pltpu.CompilerParams(
            dimension_semantics=("parallel", "parallel"),
            vmem_limit_bytes=vmem_limit),
    )(xl2, xr2, tbias, w_pack, b_pack)

    return out_l.reshape(b, c, h, w), out_r.reshape(b, c, h, w)


def scam_reference(t, x_l, x_r, params, *, eps=1e-6):
    """Pure-JAX reference mirroring the PyTorch forward (for correctness check)."""
    B, C, H, W = x_l.shape
    scale = float(C) ** (-0.5)

    def ln2d(x, w, b):  # normalize over channel dim, biased variance
        mu = jnp.mean(x, axis=1, keepdims=True)
        var = jnp.mean((x - mu) ** 2, axis=1, keepdims=True)
        return (x - mu) / jnp.sqrt(var + eps) * w[None, :, None, None] + b[None, :, None, None]

    def conv1x1(x, w, b):  # w: (Cout, Cin, 1, 1)
        y = jnp.einsum("bchw,oc->bohw", x, w[:, :, 0, 0])
        return y + b[None, :, None, None]

    q_l = jnp.transpose(conv1x1(ln2d(x_l, params["lnl_w"], params["lnl_b"]),
                                params["wl1"], params["bl1"]), (0, 2, 3, 1))
    q_r_t = jnp.transpose(conv1x1(ln2d(x_r, params["lnr_w"], params["lnr_b"]),
                                  params["wr1"], params["br1"]), (0, 2, 1, 3))
    v_l = jnp.transpose(conv1x1(x_l, params["wl2"], params["bl2"]), (0, 2, 3, 1))
    v_r = jnp.transpose(conv1x1(x_r, params["wr2"], params["br2"]), (0, 2, 3, 1))

    attn = jnp.matmul(q_l, q_r_t) * scale
    f_r2l = jnp.matmul(jax.nn.softmax(attn, axis=-1), v_r)
    f_l2r = jnp.matmul(jax.nn.softmax(jnp.transpose(attn, (0, 1, 3, 2)), axis=-1), v_l)

    tm = t * jnp.tanh(jax.nn.softplus(t))
    tbias = (tm @ params["time_w"].T + params["time_b"])[:, :, None, None]

    f_r2l = jnp.transpose(f_r2l, (0, 3, 1, 2)) * params["beta"][None, :, None, None] + tbias
    f_l2r = jnp.transpose(f_l2r, (0, 3, 1, 2)) * params["gamma"][None, :, None, None] + tbias
    return x_l + f_r2l, x_r + f_l2r


if __name__ == "__main__":
    B, C, H, W = 2, 16, 8, 8
    T_EMB = 32

    key = jax.random.PRNGKey(0)
    keys = jax.random.split(key, 20)

    params = {
        # non-trivial LayerNorm affines so the weight folding is exercised
        "lnl_w": 1.0 + 0.1 * jax.random.normal(keys[15], (C,), jnp.float32),
        "lnl_b": 0.1 * jax.random.normal(keys[16], (C,), jnp.float32),
        "lnr_w": 1.0 + 0.1 * jax.random.normal(keys[17], (C,), jnp.float32),
        "lnr_b": 0.1 * jax.random.normal(keys[18], (C,), jnp.float32),
        "wl1": 0.1 * jax.random.normal(keys[0], (C, C, 1, 1), jnp.float32),
        "bl1": 0.1 * jax.random.normal(keys[1], (C,), jnp.float32),
        "wr1": 0.1 * jax.random.normal(keys[2], (C, C, 1, 1), jnp.float32),
        "br1": 0.1 * jax.random.normal(keys[3], (C,), jnp.float32),
        "wl2": 0.1 * jax.random.normal(keys[4], (C, C, 1, 1), jnp.float32),
        "bl2": 0.1 * jax.random.normal(keys[5], (C,), jnp.float32),
        "wr2": 0.1 * jax.random.normal(keys[6], (C, C, 1, 1), jnp.float32),
        "br2": 0.1 * jax.random.normal(keys[7], (C,), jnp.float32),
        # beta/gamma are zero-init in the PyTorch module; use nonzero here so the
        # cross-attention path is actually exercised (init is synthetic anyway).
        "beta": 0.5 * jax.random.normal(keys[8], (C,), jnp.float32),
        "gamma": 0.5 * jax.random.normal(keys[9], (C,), jnp.float32),
        "time_w": 0.1 * jax.random.normal(keys[10], (C, T_EMB), jnp.float32),
        "time_b": 0.1 * jax.random.normal(keys[11], (C,), jnp.float32),
    }

    t = jax.random.normal(keys[12], (B, T_EMB), jnp.float32)
    x_l = jax.random.normal(keys[13], (B, C, H, W), jnp.float32)
    x_r = jax.random.normal(keys[14], (B, C, H, W), jnp.float32)

    ref_l, ref_r = scam_reference(t, x_l, x_r, params)

    # f32 storage + f32 MXU operands: tight check (only deviation is the
    # approximate EUP reciprocal in the softmax denominator).
    out_l, out_r = scam_forward(t, x_l, x_r, params, compute_dtype=jnp.float32)
    jax.block_until_ready((out_l, out_r))
    assert jnp.allclose(out_l, ref_l, atol=2e-3, rtol=2e-3)
    assert jnp.allclose(out_r, ref_r, atol=2e-3, rtol=2e-3)

    # bf16 MXU operands (default; bf16-native MXU on v6e/v7x): looser tolerance.
    bf_l, bf_r = scam_forward(t, x_l, x_r, params)
    jax.block_until_ready((bf_l, bf_r))
    assert jnp.allclose(bf_l, ref_l, atol=3e-2, rtol=3e-2)
    assert jnp.allclose(bf_r, ref_r, atol=3e-2, rtol=3e-2)

    # bf16 HBM storage (recommended production config: halves I/O bytes of a
    # memory-bound kernel); outputs come back in bf16.
    s_l, s_r = scam_forward(t, x_l.astype(jnp.bfloat16), x_r.astype(jnp.bfloat16), params)
    jax.block_until_ready((s_l, s_r))
    assert s_l.dtype == jnp.bfloat16 and s_r.dtype == jnp.bfloat16
    assert jnp.allclose(s_l.astype(jnp.float32), ref_l, atol=1e-1, rtol=1e-1)
    assert jnp.allclose(s_r.astype(jnp.float32), ref_r, atol=1e-1, rtol=1e-1)

    print("KERNEL_OK")
</pallas_src>

<mosaic_0001>
module attributes {stable_mosaic.version = 11 : i64} {
  func.func @scam_kernel(%arg0: i32, %arg1: i32, %arg2: memref<1x16x64xf32, #tpu.memory_space<vmem>>, %arg3: memref<1x16x64xf32, #tpu.memory_space<vmem>>, %arg4: memref<1x1x16xf32, #tpu.memory_space<vmem>>, %arg5: memref<4x16x16xf32, #tpu.memory_space<vmem>>, %arg6: memref<4x16xf32, #tpu.memory_space<vmem>>, %arg7: memref<1x16x64xf32, #tpu.memory_space<vmem>>, %arg8: memref<1x16x64xf32, #tpu.memory_space<vmem>>) attributes {dimension_semantics = [#tpu.dimension_semantics<parallel>, #tpu.dimension_semantics<parallel>], iteration_bounds = array<i64: 2, 1>, scalar_prefetch = 0 : i64, scratch_operands = 0 : i64, tpu.core_type = #tpu.core_type<tc>, window_params = [{transform_indices = @transform_0, window_bounds = array<i64: 1, 16, 64>}, {transform_indices = @transform_1, window_bounds = array<i64: 1, 16, 64>}, {transform_indices = @transform_2, window_bounds = array<i64: 1, 1, 16>}, {pipeline_mode = #tpu.pipeline_mode<synchronous>, transform_indices = @transform_3, window_bounds = array<i64: 4, 16, 16>}, {pipeline_mode = #tpu.pipeline_mode<synchronous>, transform_indices = @transform_4, window_bounds = array<i64: 4, 16>}, {transform_indices = @transform_5, window_bounds = array<i64: 1, 16, 64>}, {transform_indices = @transform_6, window_bounds = array<i64: 1, 16, 64>}]} {
    %c0 = arith.constant 0 : index
    %c0_0 = arith.constant 0 : index
    %c0_1 = arith.constant 0 : index
    %0 = vector.load %arg2[%c0, %c0_0, %c0_1] : memref<1x16x64xf32, #tpu.memory_space<vmem>>, vector<1x16x64xf32>
    %1 = vector.shape_cast %0 : vector<1x16x64xf32> to vector<16x64xf32>
    %2 = tpu.transpose %1, [1, 0] : vector<16x64xf32> -> vector<64x16xf32>
    %c0_2 = arith.constant 0 : index
    %c0_3 = arith.constant 0 : index
    %c0_4 = arith.constant 0 : index
    %3 = vector.load %arg3[%c0_2, %c0_3, %c0_4] : memref<1x16x64xf32, #tpu.memory_space<vmem>>, vector<1x16x64xf32>
    %4 = vector.shape_cast %3 : vector<1x16x64xf32> to vector<16x64xf32>
    %5 = tpu.transpose %4, [1, 0] : vector<16x64xf32> -> vector<64x16xf32>
    %cst = arith.constant dense<0.000000e+00> : vector<64xf32>
    %6 = vector.multi_reduction <add>, %2, %cst [1] : vector<64x16xf32> to vector<64xf32>
    %7 = vector.shape_cast %6 : vector<64xf32> to vector<64x1xf32>
    %cst_5 = arith.constant 1.600000e+01 : f32
    %8 = vector.broadcast %cst_5 : f32 to vector<64x1xf32>
    %9 = arith.divf %7, %8 : vector<64x1xf32>
    %10 = vector.broadcast %9 : vector<64x1xf32> to vector<64x16xf32>
    %11 = arith.subf %2, %10 : vector<64x16xf32>
    %12 = arith.mulf %11, %11 : vector<64x16xf32>
    %cst_6 = arith.constant dense<0.000000e+00> : vector<64xf32>
    %13 = vector.multi_reduction <add>, %12, %cst_6 [1] : vector<64x16xf32> to vector<64xf32>
    %14 = vector.shape_cast %13 : vector<64xf32> to vector<64x1xf32>
    %cst_7 = arith.constant 1.600000e+01 : f32
    %15 = vector.broadcast %cst_7 : f32 to vector<64x1xf32>
    %16 = arith.divf %14, %15 : vector<64x1xf32>
    %17 = vector.broadcast %9 : vector<64x1xf32> to vector<64x16xf32>
    %18 = arith.subf %2, %17 : vector<64x16xf32>
    %cst_8 = arith.constant 9.99999997E-7 : f32
    %19 = vector.broadcast %cst_8 : f32 to vector<64x1xf32>
    %20 = arith.addf %16, %19 : vector<64x1xf32>
    %21 = math.rsqrt %20 : vector<64x1xf32>
    %22 = vector.broadcast %21 : vector<64x1xf32> to vector<64x16xf32>
    %23 = arith.mulf %18, %22 : vector<64x16xf32>
    %cst_9 = arith.constant dense<0.000000e+00> : vector<64xf32>
    %24 = vector.multi_reduction <add>, %5, %cst_9 [1] : vector<64x16xf32> to vector<64xf32>
    %25 = vector.shape_cast %24 : vector<64xf32> to vector<64x1xf32>
    %cst_10 = arith.constant 1.600000e+01 : f32
    %26 = vector.broadcast %cst_10 : f32 to vector<64x1xf32>
    %27 = arith.divf %25, %26 : vector<64x1xf32>
    %28 = vector.broadcast %27 : vector<64x1xf32> to vector<64x16xf32>
    %29 = arith.subf %5, %28 : vector<64x16xf32>
    %30 = arith.mulf %29, %29 : vector<64x16xf32>
    %cst_11 = arith.constant dense<0.000000e+00> : vector<64xf32>
    %31 = vector.multi_reduction <add>, %30, %cst_11 [1] : vector<64x16xf32> to vector<64xf32>
    %32 = vector.shape_cast %31 : vector<64xf32> to vector<64x1xf32>
    %cst_12 = arith.constant 1.600000e+01 : f32
    %33 = vector.broadcast %cst_12 : f32 to vector<64x1xf32>
    %34 = arith.divf %32, %33 : vector<64x1xf32>
    %35 = vector.broadcast %27 : vector<64x1xf32> to vector<64x16xf32>
    %36 = arith.subf %5, %35 : vector<64x16xf32>
    %cst_13 = arith.constant 9.99999997E-7 : f32
    %37 = vector.broadcast %cst_13 : f32 to vector<64x1xf32>
    %38 = arith.addf %34, %37 : vector<64x1xf32>
    %39 = math.rsqrt %38 : vector<64x1xf32>
    %40 = vector.broadcast %39 : vector<64x1xf32> to vector<64x16xf32>
    %41 = arith.mulf %36, %40 : vector<64x16xf32>
    %c0_14 = arith.constant 0 : index
    %c0_15 = arith.constant 0 : index
    %42 = vector.load %arg6[%c0_14, %c0_15] : memref<4x16xf32, #tpu.memory_space<vmem>>, vector<4x16xf32>
    %c0_16 = arith.constant 0 : index
    %c0_17 = arith.constant 0 : index
    %c0_18 = arith.constant 0 : index
    %43 = vector.load %arg5[%c0_16, %c0_17, %c0_18] : memref<4x16x16xf32, #tpu.memory_space<vmem>>, vector<1x16x16xf32>
    %44 = vector.shape_cast %43 : vector<1x16x16xf32> to vector<16x16xf32>
    %cst_19 = arith.constant dense<0.000000e+00> : vector<64x16xf32>
    %45 = tpu.matmul %23, %44, %cst_19 {dimension_numbers = #tpu.dot_dimension_numbers<[1], [0], [0], [1], [0, 0, 1, 1], [], []>} : vector<64x16xf32>, vector<16x16xf32>, vector<64x16xf32> -> vector<64x16xf32>
    %46 = vector.extract_strided_slice %42 {offsets = [0, 0], sizes = [1, 16], strides = [1, 1]} : vector<4x16xf32> to vector<1x16xf32>
    %47 = vector.broadcast %46 : vector<1x16xf32> to vector<64x16xf32>
    %48 = arith.addf %45, %47 : vector<64x16xf32>
    %49 = vector.shape_cast %48 : vector<64x16xf32> to vector<8x8x16xf32>
    %c1 = arith.constant 1 : index
    %c0_20 = arith.constant 0 : index
    %c0_21 = arith.constant 0 : index
    %50 = vector.load %arg5[%c1, %c0_20, %c0_21] : memref<4x16x16xf32, #tpu.memory_space<vmem>>, vector<1x16x16xf32>
    %51 = vector.shape_cast %50 : vector<1x16x16xf32> to vector<16x16xf32>
    %cst_22 = arith.constant dense<0.000000e+00> : vector<64x16xf32>
    %52 = tpu.matmul %41, %51, %cst_22 {dimension_numbers = #tpu.dot_dimension_numbers<[1], [0], [0], [1], [0, 0, 1, 1], [], []>} : vector<64x16xf32>, vector<16x16xf32>, vector<64x16xf32> -> vector<64x16xf32>
    %53 = vector.extract_strided_slice %42 {offsets = [1, 0], sizes = [1, 16], strides = [1, 1]} : vector<4x16xf32> to vector<1x16xf32>
    %54 = vector.broadcast %53 : vector<1x16xf32> to vector<64x16xf32>
    %55 = arith.addf %52, %54 : vector<64x16xf32>
    %56 = vector.shape_cast %55 : vector<64x16xf32> to vector<8x8x16xf32>
    %c2 = arith.constant 2 : index
    %c0_23 = arith.constant 0 : index
    %c0_24 = arith.constant 0 : index
    %57 = vector.load %arg5[%c2, %c0_23, %c0_24] : memref<4x16x16xf32, #tpu.memory_space<vmem>>, vector<1x16x16xf32>
    %58 = vector.shape_cast %57 : vector<1x16x16xf32> to vector<16x16xf32>
    %cst_25 = arith.constant dense<0.000000e+00> : vector<64x16xf32>
    %59 = tpu.matmul %2, %58, %cst_25 {dimension_numbers = #tpu.dot_dimension_numbers<[1], [0], [0], [1], [0, 0, 1, 1], [], []>} : vector<64x16xf32>, vector<16x16xf32>, vector<64x16xf32> -> vector<64x16xf32>
    %60 = vector.extract_strided_slice %42 {offsets = [2, 0], sizes = [1, 16], strides = [1, 1]} : vector<4x16xf32> to vector<1x16xf32>
    %61 = vector.broadcast %60 : vector<1x16xf32> to vector<64x16xf32>
    %62 = arith.addf %59, %61 : vector<64x16xf32>
    %63 = vector.shape_cast %62 : vector<64x16xf32> to vector<8x8x16xf32>
    %c3 = arith.constant 3 : index
    %c0_26 = arith.constant 0 : index
    %c0_27 = arith.constant 0 : index
    %64 = vector.load %arg5[%c3, %c0_26, %c0_27] : memref<4x16x16xf32, #tpu.memory_space<vmem>>, vector<1x16x16xf32>
    %65 = vector.shape_cast %64 : vector<1x16x16xf32> to vector<16x16xf32>
    %cst_28 = arith.constant dense<0.000000e+00> : vector<64x16xf32>
    %66 = tpu.matmul %5, %65, %cst_28 {dimension_numbers = #tpu.dot_dimension_numbers<[1], [0], [0], [1], [0, 0, 1, 1], [], []>} : vector<64x16xf32>, vector<16x16xf32>, vector<64x16xf32> -> vector<64x16xf32>
    %67 = vector.extract_strided_slice %42 {offsets = [3, 0], sizes = [1, 16], strides = [1, 1]} : vector<4x16xf32> to vector<1x16xf32>
    %68 = vector.broadcast %67 : vector<1x16xf32> to vector<64x16xf32>
    %69 = arith.addf %66, %68 : vector<64x16xf32>
    %70 = vector.shape_cast %69 : vector<64x16xf32> to vector<8x8x16xf32>
    "tpu.trace_start"() <{level = 10 : i32, message = "rwc,rvc->rwv"}> : () -> ()
    %cst_29 = arith.constant dense<0.000000e+00> : vector<8x8x8xf32>
    %71 = tpu.matmul %49, %56, %cst_29 {dimension_numbers = #tpu.dot_dimension_numbers<[2], [2], [1], [1], [0, 0, 0, 1, 1, 1], [0], [0]>} : vector<8x8x16xf32>, vector<8x8x16xf32>, vector<8x8x8xf32> -> vector<8x8x8xf32>
    "tpu.trace_stop"() : () -> ()
    %72 = tpu.transpose %71, [0, 2, 1] : vector<8x8x8xf32> -> vector<8x8x8xf32>
    %cst_30 = arith.constant dense<0xFF800000> : vector<8x8xf32>
    %73 = vector.multi_reduction <maximumf>, %71, %cst_30 [2] : vector<8x8x8xf32> to vector<8x8xf32>
    %74 = vector.shape_cast %73 : vector<8x8xf32> to vector<8x8x1xf32>
    %75 = vector.broadcast %74 : vector<8x8x1xf32> to vector<8x8x8xf32>
    %76 = arith.subf %71, %75 : vector<8x8x8xf32>
    %77 = math.exp %76 : vector<8x8x8xf32>
    %cst_31 = arith.constant dense<0.000000e+00> : vector<8x8xf32>
    %78 = vector.multi_reduction <add>, %77, %cst_31 [2] : vector<8x8x8xf32> to vector<8x8xf32>
    %79 = vector.shape_cast %78 : vector<8x8xf32> to vector<8x8x1xf32>
    %80 = tpu.reciprocal %79 {approx = true} : vector<8x8x1xf32> -> vector<8x8x1xf32>
    %81 = vector.broadcast %80 : vector<8x8x1xf32> to vector<8x8x8xf32>
    %82 = arith.mulf %77, %81 : vector<8x8x8xf32>
    "tpu.trace_start"() <{level = 10 : i32, message = "rwv,rvc->rwc"}> : () -> ()
    %cst_32 = arith.constant dense<0.000000e+00> : vector<8x8x16xf32>
    %83 = tpu.matmul %82, %70, %cst_32 {dimension_numbers = #tpu.dot_dimension_numbers<[2], [1], [1], [2], [0, 0, 0, 1, 1, 2], [0], [0]>} : vector<8x8x8xf32>, vector<8x8x16xf32>, vector<8x8x16xf32> -> vector<8x8x16xf32>
    "tpu.trace_stop"() : () -> ()
    %84 = vector.shape_cast %83 : vector<8x8x16xf32> to vector<64x16xf32>
    %cst_33 = arith.constant dense<0xFF800000> : vector<8x8xf32>
    %85 = vector.multi_reduction <maximumf>, %72, %cst_33 [2] : vector<8x8x8xf32> to vector<8x8xf32>
    %86 = vector.shape_cast %85 : vector<8x8xf32> to vector<8x8x1xf32>
    %87 = vector.broadcast %86 : vector<8x8x1xf32> to vector<8x8x8xf32>
    %88 = arith.subf %72, %87 : vector<8x8x8xf32>
    %89 = math.exp %88 : vector<8x8x8xf32>
    %cst_34 = arith.constant dense<0.000000e+00> : vector<8x8xf32>
    %90 = vector.multi_reduction <add>, %89, %cst_34 [2] : vector<8x8x8xf32> to vector<8x8xf32>
    %91 = vector.shape_cast %90 : vector<8x8xf32> to vector<8x8x1xf32>
    %92 = tpu.reciprocal %91 {approx = true} : vector<8x8x1xf32> -> vector<8x8x1xf32>
    %93 = vector.broadcast %92 : vector<8x8x1xf32> to vector<8x8x8xf32>
    %94 = arith.mulf %89, %93 : vector<8x8x8xf32>
    "tpu.trace_start"() <{level = 10 : i32, message = "rwv,rvc->rwc"}> : () -> ()
    %cst_35 = arith.constant dense<0.000000e+00> : vector<8x8x16xf32>
    %95 = tpu.matmul %94, %63, %cst_35 {dimension_numbers = #tpu.dot_dimension_numbers<[2], [1], [1], [2], [0, 0, 0, 1, 1, 2], [0], [0]>} : vector<8x8x8xf32>, vector<8x8x16xf32>, vector<8x8x16xf32> -> vector<8x8x16xf32>
    "tpu.trace_stop"() : () -> ()
    %96 = vector.shape_cast %95 : vector<8x8x16xf32> to vector<64x16xf32>
    %c0_36 = arith.constant 0 : index
    %c0_37 = arith.constant 0 : index
    %c0_38 = arith.constant 0 : index
    %97 = vector.load %arg4[%c0_36, %c0_37, %c0_38] : memref<1x1x16xf32, #tpu.memory_space<vmem>>, vector<1x1x16xf32>
    %98 = vector.shape_cast %97 : vector<1x1x16xf32> to vector<1x16xf32>
    %99 = arith.addf %2, %84 : vector<64x16xf32>
    %100 = vector.broadcast %98 : vector<1x16xf32> to vector<64x16xf32>
    %101 = arith.addf %99, %100 : vector<64x16xf32>
    %102 = tpu.transpose %101, [1, 0] : vector<64x16xf32> -> vector<16x64xf32>
    %c0_39 = arith.constant 0 : index
    %c0_40 = arith.constant 0 : index
    %c0_41 = arith.constant 0 : index
    %103 = vector.load %arg7[%c0_39, %c0_40, %c0_41] : memref<1x16x64xf32, #tpu.memory_space<vmem>>, vector<1x16x64xf32>
    %104 = vector.shape_cast %103 : vector<1x16x64xf32> to vector<16x64xf32>
    %105 = vector.shape_cast %102 : vector<16x64xf32> to vector<1x16x64xf32>
    tpu.vector_store %arg7[%c0_39, %c0_40, %c0_41], %105 {strides = array<i32>} : memref<1x16x64xf32, #tpu.memory_space<vmem>>, vector<1x16x64xf32>,
    %106 = arith.addf %5, %96 : vector<64x16xf32>
    %107 = vector.broadcast %98 : vector<1x16xf32> to vector<64x16xf32>
    %108 = arith.addf %106, %107 : vector<64x16xf32>
    %109 = tpu.transpose %108, [1, 0] : vector<64x16xf32> -> vector<16x64xf32>
    %c0_42 = arith.constant 0 : index
    %c0_43 = arith.constant 0 : index
    %c0_44 = arith.constant 0 : index
    %110 = vector.load %arg8[%c0_42, %c0_43, %c0_44] : memref<1x16x64xf32, #tpu.memory_space<vmem>>, vector<1x16x64xf32>
    %111 = vector.shape_cast %110 : vector<1x16x64xf32> to vector<16x64xf32>
    %112 = vector.shape_cast %109 : vector<16x64xf32> to vector<1x16x64xf32>
    tpu.vector_store %arg8[%c0_42, %c0_43, %c0_44], %112 {strides = array<i32>} : memref<1x16x64xf32, #tpu.memory_space<vmem>>, vector<1x16x64xf32>,
    return
  }
  func.func @transform_0(%arg0: i32, %arg1: i32) -> (i32, i32, i32) {
    %c0_i32 = arith.constant 0 : i32
    %c0_i32_0 = arith.constant 0 : i32
    return %arg0, %c0_i32, %arg1 : i32, i32, i32
  }
  func.func @transform_1(%arg0: i32, %arg1: i32) -> (i32, i32, i32) {
    %c0_i32 = arith.constant 0 : i32
    %c0_i32_0 = arith.constant 0 : i32
    return %arg0, %c0_i32, %arg1 : i32, i32, i32
  }
  func.func @transform_2(%arg0: i32, %arg1: i32) -> (i32, i32, i32) {
    %c0_i32 = arith.constant 0 : i32
    %c0_i32_0 = arith.constant 0 : i32
    %c0_i32_1 = arith.constant 0 : i32
    return %arg0, %c0_i32, %c0_i32_0 : i32, i32, i32
  }
  func.func @transform_3(%arg0: i32, %arg1: i32) -> (i32, i32, i32) {
    %c0_i32 = arith.constant 0 : i32
    %c0_i32_0 = arith.constant 0 : i32
    %c0_i32_1 = arith.constant 0 : i32
    %c0_i32_2 = arith.constant 0 : i32
    return %c0_i32, %c0_i32_0, %c0_i32_1 : i32, i32, i32
  }
  func.func @transform_4(%arg0: i32, %arg1: i32) -> (i32, i32) {
    %c0_i32 = arith.constant 0 : i32
    %c0_i32_0 = arith.constant 0 : i32
    %c0_i32_1 = arith.constant 0 : i32
    return %c0_i32, %c0_i32_0 : i32, i32
  }
  func.func @transform_5(%arg0: i32, %arg1: i32) -> (i32, i32, i32) {
    %c0_i32 = arith.constant 0 : i32
    %c0_i32_0 = arith.constant 0 : i32
    return %arg0, %c0_i32, %arg1 : i32, i32, i32
  }
  func.func @transform_6(%arg0: i32, %arg1: i32) -> (i32, i32, i32) {
    %c0_i32 = arith.constant 0 : i32
    %c0_i32_0 = arith.constant 0 : i32
    return %arg0, %c0_i32, %arg1 : i32, i32, i32
  }
}

</mosaic_0001>

<bundles_post_ra>
// kernel: tpu_custom_call.1
= control target key start
LH: loop header
LB: loop body
LE: loop exit
PB: predicated region body
PF: predicated region fallthrough
CT: control target
= control target key end

     0   :  { %s5372_s0 = inlined_call_operand.hbm [shape: f32[2,16,64], index: 0, kind: input, shape index: {}]   ;;  %s5373_s1 = inlined_call_operand.hbm [shape: f32[2,16,64], index: 1, kind: input, shape index: {}]   ;;  %s5374_s2 = inlined_call_operand.vmem [shape: f32[2,1,16], index: 2, kind: input, shape index: {}]   ;;  %s5375_s3 = inlined_call_operand.hbm [shape: f32[4,16,16], index: 3, kind: input, shape index: {}]   ;;  %s5376_s4 = inlined_call_operand.vmem [shape: f32[4,16], index: 4, kind: input, shape index: {}]   ;;  %s5377_s5 = inlined_call_operand.hbm [shape: f32[2,16,64], index: 5, kind: output, shape index: {0}]   ;;  %s5378_s6 = inlined_call_operand.hbm [shape: f32[2,16,64], index: 6, kind: output, shape index: {1}]  }
   0x1   :  { %5386 = sst [smem:[#allocation20_spill]] %s5375_s3 }
   0x2   :  { %12 = vsyncpa [#allocation3], 0 }
   0x3   :  { %14 = vsyncpa [#allocation3 + $0x1], 0 }
   0x4   :  { %15 = vsyncpa [#allocation6], 0 }
   0x5   :  { %17 = vsyncpa [#allocation6 + $0x1], 0 }
   0x6   :  { %18 = vsyncpa [#allocation4], 0 }
   0x7   :  { %20 = vsyncpa [#allocation4 + $0x1], 0 }
   0x8   :  { %21 = vsyncpa [#allocation10], 0 }
   0x9   :  { %23 = vsyncpa [#allocation10 + $0x1], 0  ;;  %s4508_s21 = smov 0   ;;  %s4510_s22 = smov 0  }
   0xa   :  { %s4512_s23 = smov 0   ;;  %s4514_s24 = smov 0  }
   0xb   :  { %s4516_s25 = smov 0   ;;  %s4518_s26 = smov 0  }
   0xc LB: > { %5387 = sst [smem:[#allocation16_spill]] %s4456_s25  ;;  %s4539_s27 = sadd.s32 4294967295, %s4460_s26   ;;  %s4460_s26 = sphi %s4518_s26, %s29_s26   ;;  %s4456_s25 = sphi %s4516_s25, %s5407_s25   ;;  %s4452_s24 = sphi %s4514_s24, %s5406_s24   ;;  %s4448_s23 = sphi %s4512_s23, %s5410_s23   ;;  %s4444_s22 = sphi %s4510_s22, %s5409_s22   ;;  %s4440_s21 = sphi %s4508_s21, %s5408_s21  }
   0xd   : > { %s3710_s28 = sadd.s32 4294967294, %s4460_s26   ;;  %p63_p0 = scmp.ne.s32.totalorder %s4444_s22, %s4440_s21 }
   0xe   : > { %p64_p1 = scmp.eq.s32.totalorder %s4539_s27, 0  ;;  %p191_p3 = scmp.eq.s32.totalorder %s3710_s28, 1 }
   0xf   : > { %p3711_p5 = scmp.ge.s32.totalorder %s4460_s26, 1  ;;  %p226_p7 = scmp.lt.s32.totalorder %s4460_s26, 3 }
  0x10   : > { %p4548_p4 = por %p64_p1, %p63_p0  ;;  %p4553_p6 = por %p191_p3, %p63_p0 }
  0x11   : > { %p4558_p8 = pnand %p3711_p5, %p226_p7  ;;  %s4462_s8 = smov [#allocation7]  }
  0x12   : > { %s5389_s30 = scalar_select %p4553_p6, 1, 0 }
  0x13   : > { %s238_s9 = sshll.u32 %s4462_s8, 4  ;;  %p4087_p9 = pneg %p4558_p8  ;;  %s239_s9 = int_to_ptr.vmem [resolvable:$true] %s238_s9 }
  0x14   : > { %5390 = sst [smem:[#allocation17_spill]] %s5389_s30  ;;  %s41_s11 = sadd.s32 1, %s4456_s25 }
  0x15   : > { %p4567_p11 = pnand %p4087_p9, %p64_p1  ;;  %s4271_s12 = scalar_lea.vmem %s239_s9, 1024 }
  0x16   : > { %p4272_p13 = scmp.ne.s32.totalorder %s239_s9, %s4271_s12  ;;  %p4279_p5 = scmp.lt.s32.totalorder %s239_s9, %s239_s9 }
  0x17   : > { %p4262_p12 = pneg %p4567_p11  ;;  %p4280_p7 = scmp.lt.s32.totalorder %s4271_s12, %s4271_s12 }
  0x19   : > { %p4274_p0 = pnand %p4272_p13, %p4262_p12  ;;  %p4281_p2 = por %p4280_p7, %p4279_p5 }
  0x1b   : > { %p4275_p3 = pneg %p4274_p0 }
  0x1d   : > { %p4282_p6 = pnand %p4281_p2, %p4275_p3 }
  0x1f   : > { %4285 = shalt.err (!%p4282_p6)
}
  0x20   : > { %s5379_s13 = smov 128   ;;  %s5381_s14 = smov 8  }
  0x21   : > { %s5393_s3 = sld [smem:[#allocation20_spill]]  ;;  %p43_p2 = scmp.ge.s32.totalorder %s41_s11, 2 }
  0x22   : > { %s50_s17 = sadd.s32 1, %s4448_s23  ;;  %p57_p6 = scmp.ne.s32.totalorder %s4448_s23, %s4444_s22 }
  0x23   : > { %p58_p9 = scmp.eq.s32.totalorder %s4460_s26, 0  ;;  %s5412_s11 = smov (%p43_p2, %s41_s11), 0 }
  0x24   : > { %5394 = sst [smem:[#allocation18_spill]] %s5412_s11  ;;  %p5396_p13 = scmp.eq.s32.totalorder %s4539_s27, 1 }
  0x25   : > { %p4588_p12 = por %p58_p9, %p57_p6  ;;  %s45_s20 = ssub.s32 %s4456_s25, %s5412_s11 }
  0x26   : > { %p4594_p0 = por %p5396_p13, %p57_p6  ;;  %p4106_p3 = scmp.lt.s32.totalorder %s4460_s26, 2 }
  0x27   : > { %4090 = dma.hbm_to_vmem [thread:$0]  (!%p4567_p11), %s5393_s3, 1024, %s239_s9, [#allocation6], %s5379_s13, %s5379_s13, %s5381_s14  }
  0x28   : > { %p48_p11 = scmp.eq.s32.totalorder %s45_s20, 0  ;;  %s255_s28 = sand.u32 1, %s4448_s23  }
  0x29   : > { %s3714_s8 = sshll.u32 %s255_s28, 4  ;;  %s3799_s10 = sshll.u32 %s4456_s25, 8 }
  0x2a   : > { %s4603_s9 = scalar_select %p48_p11, %s4448_s23, %s50_s17  }
  0x2b   : > { %s266_s16 = scalar_lea.hbm %s5372_s0, %s3799_s10  ;;  %s259_s13 = scalar_lea.vmem [#allocation2], %s3714_s8 }
  0x2c   : > { %5398 = sst [smem:[#allocation19_spill]] %s4603_s9  ;;  %s267_s14 = sshll.u32 %s259_s13, 4  ;;  %s268_s14 = int_to_ptr.vmem [resolvable:$true] %s267_s14 }
  0x2d   : > { %p4611_p5 = pnand %p4106_p3, %p4588_p12  ;;  %s4618_s17 = scalar_lea.hbm %s5373_s1, %s3799_s10 }
  0x2e   : > { %s281_s20 = scalar_lea.vmem [#allocation5], %s3714_s8  ;;  %s256_s9 = scalar_lea.sflag [#allocation3], %s255_s28 }
  0x2f   : > { %s289_s25 = sshll.u32 %s281_s20, 4  ;;  %p4288_p7 = pneg %p4611_p5  ;;  %s290_s25 = int_to_ptr.vmem [resolvable:$true] %s289_s25 }
  0x30   : > { %s4299_s12 = scalar_lea.vmem %s268_s14, 256  ;;  %s4465_s13 = smov [#allocation2]  }
  0x31   : > { %p4300_p2 = scmp.ne.s32.totalorder %s268_s14, %s4299_s12  ;;  %s4304_s18 = sshll.u32 %s4465_s13, 4  ;;  %s4305_s18 = int_to_ptr.vmem [resolvable:$false] %s4304_s18 }
  0x32   : > { %s4306_s15 = scalar_lea.vmem %s4305_s18, 512  ;;  %p4307_p12 = scmp.lt.s32.totalorder %s268_s14, %s4305_s18 }
  0x33   : > { %p4302_p6 = pnand %p4300_p2, %p4288_p7  ;;  %p4308_p13 = scmp.lt.s32.totalorder %s4306_s15, %s4299_s12 }
  0x35   : > { %p4303_p9 = pneg %p4302_p6  ;;  %p4309_p3 = por %p4308_p13, %p4307_p12 }
  0x37   : > { %p4310_p11 = pnand %p4309_p3, %p4303_p9 }
  0x39   : > { %4313 = shalt.err (!%p4310_p11)
}
  0x3a   : > { %s5400_s30 = smov 8   ;;  %s5401_s11 = smov 128  }
  0x3b   : > { %4094 = dma.hbm_to_vmem [thread:$0]  (!%p4611_p5), %s266_s16, 256, %s268_s14, %s256_s9, %s5401_s11, %s5401_s11, %s5400_s30  }
  0x3c   : > { %s277_s28 = sand.u32 1, %s4460_s26   ;;  %s4327_s10 = scalar_lea.vmem %s290_s25, 256 }
  0x3d   : > { %s278_s8 = scalar_lea.sflag [#allocation6], %s277_s28  ;;  %p4328_p2 = scmp.ne.s32.totalorder %s290_s25, %s4327_s10 }
  0x3e   : > { %s4466_s20 = smov [#allocation5]  }
  0x3f   : > { %p4330_p6 = pnand %p4328_p2, %p4288_p7  ;;  %s4332_s12 = sshll.u32 %s4466_s20, 4  ;;  %s4333_s12 = int_to_ptr.vmem [resolvable:$false] %s4332_s12 }
  0x40   : > { %s4334_s13 = scalar_lea.vmem %s4333_s12, 512  ;;  %p4335_p9 = scmp.lt.s32.totalorder %s290_s25, %s4333_s12 }
  0x41   : > { %p4331_p10 = pneg %p4330_p6  ;;  %p4336_p12 = scmp.lt.s32.totalorder %s4334_s13, %s4327_s10 }
  0x43   : > { %p4337_p13 = por %p4336_p12, %p4335_p9 }
  0x45   : > { %p4338_p3 = pnand %p4337_p13, %p4331_p10 }
  0x47   : > { %4341 = shalt.err (!%p4338_p3)
}
  0x48   : > { %4097 = dma.hbm_to_vmem [thread:$0]  (!%p4611_p5), %s4618_s17, 256, %s290_s25, %s278_s8, %s5401_s11, %s5401_s11, %s5400_s30  }
  0x49   : > { %307 = sbr.rel (%p4558_p8) target bundleno = 1853 (0x73d), region = 40  ;;  %s4643_s14 = sand.u32 (!%p4558_p8), 1, %s4444_s22  }
  0x4a   : > { %s4646_s9 = sshll.u32 (!%p4558_p8), %s4643_s14, 4  ;;  %s310_s16 = scalar_lea.sflag (!%p4558_p8), [#allocation3], %s4643_s14 }
  0x4b   : > { %s313_s18 = scalar_lea.vmem (!%p4558_p8), [#allocation2], %s4646_s9 }
  0x4e   : > { %4419 = dma.done.wait (%p4548_p4), %s310_s16, 256  }
  0x4f   : > { %4421 = vsyncadd (%p4548_p4), %s310_s16, 4294967040  ;;  %s318_s3 = sand.u32 1, %s4539_s27   ;;  %s322_s7 = scalar_lea.vmem [#allocation5], %s4646_s9 }
  0x50   : > { %s319_s25 = scalar_lea.sflag [#allocation6], %s318_s3 }
  0x51   : > { %4423 = dma.done.wait (%p4548_p4), %s319_s25, 256  }
  0x52   : > { %4425 = vsyncadd (%p4548_p4), %s319_s25, 4294967040 }
  0x53   : > { %4427 = dma.done.wait (%p64_p1), [#allocation6], 1024  }
  0x54   : > { %4429 = vsyncadd (%p64_p1), [#allocation6], 4294966272  ;;  %v405_v0 = vld [vmem:[%s322_s7] sm:$0xff]  ;;  %v406_v2 = vld [vmem:[%s322_s7 + $0x8] sm:$0xff]  ;;  %vm439_vm0 = vcmask 130048   ;;  %vm4468_vm1 = vmmov 0  }
  0x55   : > { %v371_v1 = vld [vmem:[%s313_s18] sm:$0xff]  ;;  %407 = vxpose.xlu0.b32.start [1/2] (short) (narrow) %v405_v0, 64  ;;  %v372_v3 = vld [vmem:[%s313_s18 + $0x8] sm:$0xff]  ;;  %vm2057_vm2 = vcmask 64512   ;;  %p368_p1 = scmp.lt.s32.totalorder %s4452_s24, 1  ;;  %vm3457_vm3 = vcmask 523264  }
  0x56   : > { %373 = vxpose.xlu1.b32.start [1/2] (short) (narrow) %v371_v1, 64  ;;  %s360_s28 = scalar_lea.vmem [#allocation8], %s4646_s9  ;;  %s3801_s10 = sshll.u32 %s4452_s24, 8 }
  0x57   : > { %s369_s17 = scalar_select %p368_p1, %s4452_s24, 1 }
  0x58   : > { %s3530_s8 = sshll.u32 %s360_s28, 4  ;;  %s5284_s13 = scalar_lea.hbm %s5377_s5, %s3801_s10  ;;  %s5276_s8 = int_to_ptr.vmem [resolvable:$true] %s3530_s8 }
  0x59   : > { %408 = vxpose.xlu0.b32.end [2/2] (short) (narrow) %v406_v2, 64  ;;  %s370_s11 = scalar_lea.vmem %s5374_s2, %s369_s17  ;;  %s3511_s16 = scalar_lea.sflag [#allocation4], %s4643_s14 }
  0x5a   : > { %374 = vxpose.xlu1.b32.end [2/2] (short) (narrow) %v372_v3, 64  ;;  %s4342_s18 = scalar_lea.vmem %s5276_s8, 256  ;;  %s4469_s3 = smov [#allocation8]  }
  0x5b   : > { %p4343_p4 = scmp.ne.s32.totalorder %s5276_s8, %s4342_s18  ;;  %s4346_s25 = sshll.u32 %s4469_s3, 4  ;;  %s4347_s25 = int_to_ptr.vmem [resolvable:$false] %s4346_s25 }
  0x5c   : > { %s4348_s7 = scalar_lea.vmem %s4347_s25, 512  ;;  %p4349_p5 = scmp.lt.s32.totalorder %s5276_s8, %s4347_s25 }
  0x5d   : > { %p4344_p8 = pnand %p4343_p4, %p4594_p0  ;;  %p4350_p7 = scmp.lt.s32.totalorder %s4348_s7, %s4342_s18 }
  0x5f   : > { %p4345_p10 = pneg %p4344_p8  ;;  %p4351_p11 = por %p4350_p7, %p4349_p5 }
  0x61   : > { %p4352_p2 = pnand %p4351_p11, %p4345_p10 }
  0xd1   : > { %v4664_v4 = vpop.trf.xlu0 }
  0xd2   : > { %v4666_v5 = vpop.trf.xlu1  ;;  %v545_v6 = vsel %vm439_vm0, %v4664_v4, 0.0 }
  0xd3   : > { %v440_v7 = vsel %vm439_vm0, %v4666_v5, 0.0  ;;  %546 = vadd.xlane.f32.xlu0 %v545_v6 }
  0xd4   : > { %441 = vadd.xlane.f32.xlu1 %v440_v7 }
  0xd5   : > { %v4672_v8 = vpop.trf.xlu0 }
  0xd6   : > { %v4674_v9 = vpop.trf.xlu1  ;;  %v548_v10 = vsel %vm439_vm0, %v4672_v8, 0.0 }
  0xd7   : > { %v443_v11 = vsel %vm439_vm0, %v4674_v9, 0.0 }
  0xd8   : > { %549 = vadd.xlane.f32.xlu1 %v548_v10 }
  0xd9   : > { %v4680_v12 = vpop.trf.xlu0 }
  0xda   : > { %v4682_v13 = vpop.trf.xlu1  ;;  %v551_v14 = vsel %vm439_vm0, %v4680_v12, 0.0 }
  0xdb   : > { %552 = vadd.xlane.f32.xlu0 %v551_v14  ;;  %v446_v15 = vsel %vm439_vm0, %v4682_v13, 0.0 }
  0xdc   : > { %444 = vadd.xlane.f32.xlu1 %v443_v11 }
  0xdd   : > { %v4688_v16 = vpop.trf.xlu0 }
  0xde   : > { %v4690_v17 = vpop.trf.xlu1  ;;  %v554_v18 = vsel %vm439_vm0, %v4688_v16, 0.0 }
  0xdf   : > { %447 = vadd.xlane.f32.xlu0 %v446_v15  ;;  %v449_v19 = vsel %vm439_vm0, %v4690_v17, 0.0 }
  0xe0   : > { %555 = vadd.xlane.f32.xlu1 %v554_v18 }
  0xe1   : > { %v4696_v20 = vpop.trf.xlu0 }
  0xe2   : > { %v4698_v21 = vpop.trf.xlu1  ;;  %v557_v22 = vsel %vm439_vm0, %v4696_v20, 0.0 }
  0xe3   : > { %558 = vadd.xlane.f32.xlu0 %v557_v22  ;;  %v452_v23 = vsel %vm439_vm0, %v4698_v21, 0.0 }
  0xe4   : > { %450 = vadd.xlane.f32.xlu1 %v449_v19 }
  0xe5   : > { %v4704_v24 = vpop.trf.xlu0 }
  0xe6   : > { %v4706_v25 = vpop.trf.xlu1  ;;  %v560_v26 = vsel %vm439_vm0, %v4704_v24, 0.0 }
  0xe7   : > { %453 = vadd.xlane.f32.xlu0 %v452_v23  ;;  %v455_v27 = vsel %vm439_vm0, %v4706_v25, 0.0 }
  0xe8   : > { %561 = vadd.xlane.f32.xlu1 %v560_v26 }
  0xe9   : > { %v4712_v28 = vpop.trf.xlu0 }
  0xea   : > { %v4714_v29 = vpop.trf.xlu1  ;;  %v563_v30 = vsel %vm439_vm0, %v4712_v28, 0.0 }
  0xeb   : > { %564 = vadd.xlane.f32.xlu0 %v563_v30  ;;  %v458_v31 = vsel %vm439_vm0, %v4714_v29, 0.0 }
  0xec   : > { %456 = vadd.xlane.f32.xlu1 %v455_v27 }
  0xed   : > { %v4720_v32 = vpop.trf.xlu0 }
  0xee   : > { %v4722_v33 = vpop.trf.xlu1  ;;  %v566_v34 = vsel %vm439_vm0, %v4720_v32, 0.0 }
  0xef   : > { %459 = vadd.xlane.f32.xlu0 %v458_v31  ;;  %v461_v35 = vsel %vm439_vm0, %v4722_v33, 0.0 }
  0xf0   : > { %567 = vadd.xlane.f32.xlu1 %v566_v34 }
  0xf4   : > { %462 = vadd.xlane.f32.xlu1 %v461_v35 }
 0x15c   : > { %v547_v36 = vpop.xlane.xlu0 %546 }
 0x15d   : > { %v442_v37 = vpop.xlane.xlu1 %441  ;;  %v569_v38 = vmul.f32 0.0625, %v547_v36 }
 0x15e   : > { %v465_v39 = vmul.f32 0.0625, %v442_v37 }
 0x15f   : > { %v4729_v40 = vsub.f32 %v4664_v4, %v569_v38 }
 0x160   : > { %v4732_v41 = vsub.f32 %v4666_v5, %v465_v39 }
 0x161   : > { %v550_v42 = vpop.xlane.xlu1 %549  ;;  %v585_v44 = vmul.f32 %v4729_v40, %v4729_v40 }
 0x162   : > { %v570_v43 = vmul.f32 0.0625, %v550_v42  ;;  %v481_v47 = vmul.f32 %v4732_v41, %v4732_v41 }
 0x163   : > { %v593_v46 = vsel %vm439_vm0, %v585_v44, 0.0 }
 0x164   : > { %v4737_v45 = vsub.f32 %v4672_v8, %v570_v43  ;;  %v553_v48 = vpop.xlane.xlu0 %552  ;;  %594 = vadd.xlane.f32.xlu0 %v593_v46  ;;  %v489_v55 = vsel %vm439_vm0, %v481_v47, 0.0 }
 0x165   : > { %v445_v49 = vpop.xlane.xlu1 %444  ;;  %v571_v50 = vmul.f32 0.0625, %v553_v48 }
 0x166   : > { %v466_v51 = vmul.f32 0.0625, %v445_v49  ;;  %v586_v52 = vmul.f32 %v4737_v45, %v4737_v45 }
 0x167   : > { %v4745_v53 = vsub.f32 %v4680_v12, %v571_v50 }
 0x168   : > { %v4748_v54 = vsub.f32 %v4674_v9, %v466_v51  ;;  %v596_v56 = vsel %vm439_vm0, %v586_v52, 0.0  ;;  %v448_v57 = vpop.xlane.xlu0 %447  ;;  %490 = vadd.xlane.f32.xlu0 %v489_v55 }
 0x169   : > { %597 = vadd.xlane.f32.xlu1 %v596_v56  ;;  %v556_v58 = vpop.xlane.xlu1 %555  ;;  %v467_v59 = vmul.f32 0.0625, %v448_v57  ;;  %v587_v61 = vmul.f32 %v4745_v53, %v4745_v53 }
 0x16a   : > { %v572_v60 = vmul.f32 0.0625, %v556_v58  ;;  %v482_v62 = vmul.f32 %v4748_v54, %v4748_v54 }
 0x16b   : > { %v4757_v63 = vsub.f32 %v4682_v13, %v467_v59  ;;  %v599_v1 = vsel %vm439_vm0, %v587_v61, 0.0 }
 0x16c   : > { %v4760_v0 = vsub.f32 %v4688_v16, %v572_v60  ;;  %v492_v2 = vsel %vm439_vm0, %v482_v62, 0.0  ;;  %v559_v3 = vpop.xlane.xlu0 %558  ;;  %600 = vadd.xlane.f32.xlu0 %v599_v1 }
 0x16d   : > { %493 = vadd.xlane.f32.xlu1 %v492_v2  ;;  %v451_v6 = vpop.xlane.xlu1 %450  ;;  %v573_v7 = vmul.f32 0.0625, %v559_v3  ;;  %v483_v11 = vmul.f32 %v4757_v63, %v4757_v63 }
 0x16e   : > { %v468_v10 = vmul.f32 0.0625, %v451_v6  ;;  %v588_v14 = vmul.f32 %v4760_v0, %v4760_v0 }
 0x16f   : > { %v4769_v15 = vsub.f32 %v4696_v20, %v573_v7  ;;  %v495_v19 = vsel %vm439_vm0, %v483_v11, 0.0 }
 0x170   : > { %v4772_v18 = vsub.f32 %v4690_v17, %v468_v10  ;;  %v602_v22 = vsel %vm439_vm0, %v588_v14, 0.0  ;;  %v454_v23 = vpop.xlane.xlu0 %453  ;;  %496 = vadd.xlane.f32.xlu0 %v495_v19 }
 0x171   : > { %603 = vadd.xlane.f32.xlu1 %v602_v22  ;;  %v562_v26 = vpop.xlane.xlu1 %561  ;;  %v469_v27 = vmul.f32 0.0625, %v454_v23  ;;  %v589_v31 = vmul.f32 %v4769_v15, %v4769_v15  ;;  %v787_v22 = vld [vmem:[#allocation7 + $0x18] sm:$0xff] }
 0x172   : > { %v574_v30 = vmul.f32 0.0625, %v562_v26  ;;  %v484_v34 = vmul.f32 %v4772_v18, %v4772_v18  ;;  %3907 = vmatprep.subr.mxu1 %v787_v22  ;;  %v786_v26 = vld [vmem:[#allocation7 + $0x10] sm:$0xff] }
 0x173   : > { %v4781_v35 = vsub.f32 %v4698_v21, %v469_v27  ;;  %v605_v37 = vsel %vm439_vm0, %v589_v31, 0.0  ;;  %3908 = vmatpush3.msra.mxu1 %v787_v22  ;;  %v651_v27 = vld [vmem:[#allocation7 + $0x8] sm:$0xff]  ;;  %v4824_v31 = vld [vmem:[#allocation7 + $0x38] sm:$0xff] }
 0x174   : > { %v4784_v36 = vsub.f32 %v4704_v24, %v574_v30  ;;  %v498_v38 = vsel %vm439_vm0, %v484_v34, 0.0  ;;  %v565_v39 = vpop.xlane.xlu0 %564  ;;  %606 = vadd.xlane.f32.xlu0 %v605_v37  ;;  %3909 = vmatprep.subr.mxu1 %v786_v26  ;;  %v650_v30 = vld [vmem:[#allocation7] sm:$0xff]  ;;  %v4827_v34 = vld [vmem:[#allocation7 + $0x28] sm:$0xff] }
 0x175   : > { %499 = vadd.xlane.f32.xlu1 %v498_v38  ;;  %v457_v42 = vpop.xlane.xlu1 %456  ;;  %v575_v43 = vmul.f32 0.0625, %v565_v39  ;;  %v485_v46 = vmul.f32 %v4781_v35, %v4781_v35  ;;  %3910 = vmatpush3.msra.mxu1 %v786_v26 }
 0x176   : > { %v470_v44 = vmul.f32 0.0625, %v457_v42  ;;  %v590_v47 = vmul.f32 %v4784_v36, %v4784_v36  ;;  %3891 = vmatprep.subr.mxu0 %v651_v27  ;;  %3939 = vmatprep.subr.mxu1 %v4824_v31 }
 0x177   : > { %v4793_v48 = vsub.f32 %v4712_v28, %v575_v43  ;;  %v501_v50 = vsel %vm439_vm0, %v485_v46, 0.0  ;;  %3892 = vmatpush3.msra.mxu0 %v651_v27 }
 0x178   : > { %v4796_v49 = vsub.f32 %v4706_v25, %v470_v44  ;;  %v608_v51 = vsel %vm439_vm0, %v590_v47, 0.0  ;;  %v460_v52 = vpop.xlane.xlu0 %459  ;;  %502 = vadd.xlane.f32.xlu0 %v501_v50  ;;  %3893 = vmatprep.subr.mxu0 %v650_v30 }
 0x179   : > { %609 = vadd.xlane.f32.xlu1 %v608_v51  ;;  %v568_v55 = vpop.xlane.xlu1 %567  ;;  %v471_v56 = vmul.f32 0.0625, %v460_v52  ;;  %v591_v58 = vmul.f32 %v4793_v48, %v4793_v48  ;;  %3894 = vmatpush3.msra.mxu0 %v650_v30 }
 0x17a   : > { %v576_v57 = vmul.f32 0.0625, %v568_v55  ;;  %v486_v59 = vmul.f32 %v4796_v49, %v4796_v49  ;;  %3923 = vmatprep.subr.mxu0 %v4827_v34 }
 0x17b   : > { %v4805_v60 = vsub.f32 %v4714_v29, %v471_v56  ;;  %v611_v62 = vsel %vm439_vm0, %v591_v58, 0.0 }
 0x17c   : > { %v4808_v61 = vsub.f32 %v4720_v32, %v576_v57  ;;  %v504_v1 = vsel %vm439_vm0, %v486_v59, 0.0  ;;  %612 = vadd.xlane.f32.xlu0 %v611_v62 }
 0x17d   : > { %505 = vadd.xlane.f32.xlu1 %v504_v1  ;;  %v463_v2 = vpop.xlane.xlu1 %462  ;;  %v487_v6 = vmul.f32 %v4805_v60, %v4805_v60 }
 0x17e   : > { %v472_v3 = vmul.f32 0.0625, %v463_v2  ;;  %v592_v7 = vmul.f32 %v4808_v61, %v4808_v61 }
 0x17f   : > { %v507_v11 = vsel %vm439_vm0, %v487_v6, 0.0 }
 0x180   : > { %v4817_v10 = vsub.f32 %v4722_v33, %v472_v3  ;;  %v614_v14 = vsel %vm439_vm0, %v592_v7, 0.0  ;;  %508 = vadd.xlane.f32.xlu0 %v507_v11 }
 0x181   : > { %615 = vadd.xlane.f32.xlu1 %v614_v14 }
 0x182   : > { %v488_v19 = vmul.f32 %v4817_v10, %v4817_v10 }
 0x184   : > { %v510_v23 = vsel %vm439_vm0, %v488_v19, 0.0 }
 0x185   : > { %511 = vadd.xlane.f32.xlu1 %v510_v23 }
 0x1ed   : > { %v595_v37 = vpop.xlane.xlu0 %594 }
 0x1ee   : > { %v617_v38 = vmul.f32 0.0625, %v595_v37 }
 0x1f0   : > { %v625_v39 = vadd.f32 1e-06, %v617_v38 }
 0x1f1   : > { %v491_v42 = vpop.xlane.xlu0 %490 }
 0x1f2   : > { %v598_v43 = vpop.xlane.xlu1 %597  ;;  %4164 = vrsqrt.f32 %v625_v39  ;;  %v513_v44 = vmul.f32 0.0625, %v491_v42 }
 0x1f3   : > { %v618_v46 = vmul.f32 0.0625, %v598_v43 }
 0x1f4   : > { %v521_v47 = vadd.f32 1e-06, %v513_v44 }
 0x1f5   : > { %v626_v50 = vadd.f32 1e-06, %v618_v46  ;;  %v601_v51 = vpop.xlane.xlu0 %600 }
 0x1f6   : > { %v494_v52 = vpop.xlane.xlu1 %493  ;;  %4166 = vrsqrt.f32 %v521_v47  ;;  %v619_v55 = vmul.f32 0.0625, %v601_v51 }
 0x1f7   : > { %v514_v56 = vmul.f32 0.0625, %v494_v52  ;;  %4168 = vrsqrt.f32 %v626_v50 }
 0x1f8   : > { %v627_v57 = vadd.f32 1e-06, %v619_v55 }
 0x1f9   : > { %v522_v58 = vadd.f32 1e-06, %v514_v56  ;;  %v497_v59 = vpop.xlane.xlu0 %496  ;;  %v1058_v56 = vld [vmem:[#allocation7 + $0x30] sm:$0xff] }
 0x1fa   : > { %v604_v62 = vpop.xlane.xlu1 %603  ;;  %4170 = vrsqrt.f32 %v627_v57  ;;  %v515_v1 = vmul.f32 0.0625, %v497_v59 }
 0x1fb   : > { %v620_v2 = vmul.f32 0.0625, %v604_v62  ;;  %4172 = vrsqrt.f32 %v522_v58 }
 0x1fc   : > { %v523_v3 = vadd.f32 1e-06, %v515_v1 }
 0x1fd   : > { %v628_v6 = vadd.f32 1e-06, %v620_v2  ;;  %v607_v7 = vpop.xlane.xlu0 %606 }
 0x1fe   : > { %v500_v11 = vpop.xlane.xlu1 %499  ;;  %4174 = vrsqrt.f32 %v523_v3  ;;  %v621_v14 = vmul.f32 0.0625, %v607_v7  ;;  %v922_v7 = vld [vmem:[#allocation7 + $0x20] sm:$0xff] }
 0x1ff   : > { %v516_v19 = vmul.f32 0.0625, %v500_v11  ;;  %v4165_v22 = vpop.eup %4164  ;;  %4176 = vrsqrt.f32 %v628_v6 }
 0x200   : > { %v629_v23 = vadd.f32 1e-06, %v621_v14  ;;  %v641_v27 = vmul.f32 %v4165_v22, %v4729_v40 }
 0x201   : > { %v524_v26 = vadd.f32 1e-06, %v516_v19  ;;  %v503_v30 = vpop.xlane.xlu0 %502 }
 0x202   : > { %v610_v37 = vpop.xlane.xlu1 %609  ;;  %4178 = vrsqrt.f32 %v629_v23  ;;  %v517_v38 = vmul.f32 0.0625, %v503_v30  ;;  %3911 = vmatprep.mubr.msk.f32.mxu1 %vm439_vm0, %v641_v27 }
 0x203   : > { %v622_v39 = vmul.f32 0.0625, %v610_v37  ;;  %v4167_v42 = vpop.eup %4166  ;;  %4180 = vrsqrt.f32 %v524_v26 }
 0x204   : > { %v4169_v43 = vpop.eup %4168  ;;  %v525_v44 = vadd.f32 1e-06, %v517_v38  ;;  %v537_v47 = vmul.f32 %v4167_v42, %v4732_v41 }
 0x205   : > { %v630_v46 = vadd.f32 1e-06, %v622_v39  ;;  %v613_v50 = vpop.xlane.xlu0 %612  ;;  %v642_v52 = vmul.f32 %v4169_v43, %v4737_v45 }
 0x206   : > { %v506_v51 = vpop.xlane.xlu1 %505  ;;  %4182 = vrsqrt.f32 %v525_v44  ;;  %v623_v40 = vmul.f32 0.0625, %v613_v50  ;;  %3895 = vmatprep.mubr.msk.f32.mxu0 %vm439_vm0, %v537_v47  ;;  %v4908_v50 = vld [vmem:[%s5376_s4] sm:$0xf] }
 0x207   : > { %v518_v55 = vmul.f32 0.0625, %v506_v51  ;;  %v4171_v57 = vpop.eup %4170  ;;  %4184 = vrsqrt.f32 %v630_v46  ;;  %3912 = vmatmul.mubr.msk.f32.vlgmr.msra.gmra.mxu1 %vm439_vm0, %v642_v52 }
 0x208   : > { %v4173_v58 = vpop.eup %4172  ;;  %v631_v59 = vadd.f32 1e-06, %v623_v40  ;;  %v643_v1 = vmul.f32 %v4171_v57, %v4745_v53  ;;  %3940 = vmatpush3.msra.mxu1 %v4824_v31 }
 0x209   : > { %v526_v62 = vadd.f32 1e-06, %v518_v55  ;;  %v509_v41 = vpop.xlane.xlu0 %508  ;;  %v538_v45 = vmul.f32 %v4173_v58, %v4748_v54  ;;  %3941 = vmatprep.subr.mxu1 %v1058_v56 }
 0x20a   : > { %v616_v2 = vpop.xlane.xlu1 %615  ;;  %4186 = vrsqrt.f32 %v631_v59  ;;  %v519_v3 = vmul.f32 0.0625, %v509_v41  ;;  %3914 = vmatprep.mubr.msk.f32.mxu1 %vm439_vm0, %v643_v1  ;;  %3942 = vmatpush3.msra.mxu1 %v1058_v56 }
 0x20b   : > { %v624_v6 = vmul.f32 0.0625, %v616_v2  ;;  %v4175_v11 = vpop.eup %4174  ;;  %4188 = vrsqrt.f32 %v526_v62  ;;  %3896 = vmatmul.mubr.msk.f32.vlgmr.msra.gmra.mxu0 %vm439_vm0, %v538_v45 }
 0x20c   : > { %v4177_v14 = vpop.eup %4176  ;;  %v527_v53 = vadd.f32 1e-06, %v519_v3  ;;  %v539_v31 = vmul.f32 %v4175_v11, %v4757_v63  ;;  %3924 = vmatpush3.msra.mxu0 %v4827_v34 }
 0x20d   : > { %v632_v19 = vadd.f32 1e-06, %v624_v6  ;;  %v644_v22 = vmul.f32 %v4177_v14, %v4760_v0  ;;  %3925 = vmatprep.subr.mxu0 %v922_v7 }
 0x20e   : > { %v512_v54 = vpop.xlane.xlu1 %511  ;;  %4190 = vrsqrt.f32 %v527_v53  ;;  %3898 = vmatprep.mubr.msk.f32.mxu0 %vm439_vm0, %v539_v31  ;;  %3926 = vmatpush3.msra.mxu0 %v922_v7 }
 0x20f   : > { %v520_v23 = vmul.f32 0.0625, %v512_v54  ;;  %v4179_v26 = vpop.eup %4178  ;;  %4192 = vrsqrt.f32 %v632_v19  ;;  %3915 = vmatmul.mubr.msk.f32.gmra.mxu1 %vm439_vm0, %v644_v22 }
 0x210   : > { %v4181_v27 = vpop.eup %4180  ;;  %v645_v37 = vmul.f32 %v4179_v26, %v4769_v15 }
 0x211   : > { %v528_v30 = vadd.f32 1e-06, %v520_v23  ;;  %v540_v63 = vmul.f32 %v4181_v27, %v4772_v18 }
 0x212   : > { %3917 = vmatprep.mubr.msk.f32.mxu1 %vm439_vm0, %v645_v37 }
 0x213   : > { %4194 = vrsqrt.f32 %v528_v30  ;;  %v4183_v0 = vpop.eup %4182  ;;  %3899 = vmatmul.mubr.msk.f32.gmra.mxu0 %vm439_vm0, %v540_v63 }
 0x214   : > { %v4185_v34 = vpop.eup %4184  ;;  %v541_v38 = vmul.f32 %v4183_v0, %v4781_v35 }
 0x215   : > { %v646_v39 = vmul.f32 %v4185_v34, %v4784_v36 }
 0x216   : > { %3901 = vmatprep.mubr.msk.f32.mxu0 %vm439_vm0, %v541_v38 }
 0x217   : > { %v4187_v42 = vpop.eup %4186  ;;  %3918 = vmatmul.mubr.msk.f32.gmra.mxu1 %vm439_vm0, %v646_v39 }
 0x218   : > { %v4189_v43 = vpop.eup %4188  ;;  %v647_v15 = vmul.f32 %v4187_v42, %v4793_v48 }
 0x219   : > { %v542_v18 = vmul.f32 %v4189_v43, %v4796_v49  ;;  %v4467_v49 = vmov 0.0  }
 0x21a   : > { %3920 = vmatprep.mubr.msk.f32.mxu1 %vm439_vm0, %v647_v15  ;;  %3960 = vmatprep.subr.mxu1 %v4467_v49 }
 0x21b   : > { %v4191_v44 = vpop.eup %4190  ;;  %3902 = vmatmul.mubr.msk.f32.gmra.mxu0 %vm439_vm0, %v542_v18  ;;  %3955 = vmatprep.subr.mxu0 %v4467_v49 }
 0x21c   : > { %v4193_v46 = vpop.eup %4192  ;;  %v543_v35 = vmul.f32 %v4191_v44, %v4805_v60  ;;  %v652_v60 = vlaneseq }
 0x21d   : > { %v648_v36 = vmul.f32 %v4193_v46, %v4808_v61 }
 0x21e   : > { %3904 = vmatprep.mubr.msk.f32.mxu0 %vm439_vm0, %v543_v35  ;;  %v4902_v61 = vshrl.u32 %v652_v60, 7 }
 0x21f   : > { %3921 = vmatmul.mubr.msk.f32.gmra.mxu1 %vm439_vm0, %v648_v36 }
 0x220   : > { %v4195_v47 = vpop.eup %4194  ;;  %3943 = vmatprep.mubr.msk.f32.mxu1 %vm439_vm0, %v4664_v4  ;;  %v654_v52 = vsub.s32 0, %v4902_v61  ;;  %v1062_v27 = vsub.s32 3, %v4902_v61 }
 0x221   : > { %v544_v48 = vmul.f32 %v4195_v47, %v4817_v10  ;;  %v790_v10 = vsub.s32 1, %v4902_v61 }
 0x222   : > { %v655_v56 = vrot.slane %v4908_v50, %v654_v52  ;;  %v4943_v34 = vrot.slane %v4908_v50, %v1062_v27 }
 0x223   : > { %3905 = vmatmul.mubr.msk.f32.gmra.mxu0 %vm439_vm0, %v544_v48  ;;  %3944 = vmatmul.mubr.msk.f32.vlgmr.msra.gmra.mxu1 %vm439_vm0, %v4672_v8  ;;  %v791_v51 = vrot.slane %v4908_v50, %v790_v10 }
 0x224   : > { %3927 = vmatprep.mubr.msk.f32.mxu0 %vm439_vm0, %v4666_v5  ;;  %3946 = vmatprep.mubr.msk.f32.mxu1 %vm439_vm0, %v4680_v12 }
 0x227   : > { %3928 = vmatmul.mubr.msk.f32.vlgmr.msra.gmra.mxu0 %vm439_vm0, %v4674_v9  ;;  %3947 = vmatmul.mubr.msk.f32.gmra.mxu1 %vm439_vm0, %v4688_v16 }
 0x228   : > { %3930 = vmatprep.mubr.msk.f32.mxu0 %vm439_vm0, %v4682_v13  ;;  %3949 = vmatprep.mubr.msk.f32.mxu1 %vm439_vm0, %v4696_v20 }
 0x22b   : > { %3931 = vmatmul.mubr.msk.f32.gmra.mxu0 %vm439_vm0, %v4690_v17  ;;  %3950 = vmatmul.mubr.msk.f32.gmra.mxu1 %vm439_vm0, %v4704_v24 }
 0x22c   : > { %3933 = vmatprep.mubr.msk.f32.mxu0 %vm439_vm0, %v4698_v21  ;;  %3952 = vmatprep.mubr.msk.f32.mxu1 %vm439_vm0, %v4712_v28 }
 0x22f   : > { %3934 = vmatmul.mubr.msk.f32.gmra.mxu0 %vm439_vm0, %v4706_v25  ;;  %3953 = vmatmul.mubr.msk.f32.gmra.mxu1 %vm439_vm0, %v4720_v32 }
 0x230   : > { %3936 = vmatprep.mubr.msk.f32.mxu0 %vm439_vm0, %v4714_v29  ;;  %3962 = vmatprep.mubr.msk.f32.mxu1 %vm4468_vm1, %v4467_v49 }
 0x233   : > { %3937 = vmatmul.mubr.msk.f32.gmra.mxu0 %vm439_vm0, %v4722_v33 }
 0x234   : > { %3957 = vmatprep.mubr.msk.f32.mxu0 %vm4468_vm1, %v4467_v49 }
 0x2c7   : > { %v3913_v40 = vpop.f32.mrf.mxu1 }
 0x2c8   : > { %v888_v55 = vadd.f32 %v3913_v40, %v791_v51 }
 0x2c9   : > { %v882_v57 = vpop.f32.mrf.mxu1 }
 0x2ca   : > { %v883_v58 = vadd.f32 %v882_v57, %v791_v51  ;;  %3961 = vmatpush3.xpose.msk.msra.mxu1 %vm439_vm0, %v888_v55 }
 0x2cb   : > { %v3897_v59 = vpop.f32.mrf.mxu0  ;;  %3970 = vmatprep.subr.mxu1 %v4467_v49 }
 0x2cc   : > { %v752_v62 = vadd.f32 %v3897_v59, %v655_v56  ;;  %3956 = vmatpush3.xpose.msk.msra.mxu0 %vm439_vm0, %v883_v58 }
 0x2cd   : > { %v746_v1 = vpop.f32.mrf.mxu0  ;;  %3965 = vmatprep.subr.mxu0 %v4467_v49 }
 0x2ce   : > { %v747_v41 = vadd.f32 %v746_v1, %v655_v56  ;;  %3963 = vmatmul.mubr.msk.f32.vlgmr.msra.gmra.mxu1 %vm439_vm0, %v752_v62 }
 0x2cf   : > { %v3916_v2 = vpop.f32.mrf.mxu1  ;;  %3972 = vmatprep.mubr.msk.f32.mxu1 %vm4468_vm1, %v4467_v49 }
 0x2d0   : > { %v898_v45 = vadd.f32 %v3916_v2, %v791_v51  ;;  %3958 = vmatmul.mubr.msk.f32.vlgmr.msra.gmra.mxu0 %vm439_vm0, %v747_v41 }
 0x2d1   : > { %v892_v3 = vpop.f32.mrf.mxu1  ;;  %3967 = vmatprep.mubr.msk.f32.mxu0 %vm4468_vm1, %v4467_v49 }
 0x2d2   : > { %v893_v6 = vadd.f32 %v892_v3, %v791_v51  ;;  %3971 = vmatpush3.xpose.msk.msra.mxu1 %vm439_vm0, %v898_v45 }
 0x2d3   : > { %v3900_v7 = vpop.f32.mrf.mxu0  ;;  %3980 = vmatprep.subr.mxu1 %v4467_v49 }
 0x2d4   : > { %v762_v11 = vadd.f32 %v3900_v7, %v655_v56  ;;  %3966 = vmatpush3.xpose.msk.msra.mxu0 %vm439_vm0, %v893_v6 }
 0x2d5   : > { %v756_v14 = vpop.f32.mrf.mxu0  ;;  %3975 = vmatprep.subr.mxu0 %v4467_v49 }
 0x2d6   : > { %v757_v53 = vadd.f32 %v756_v14, %v655_v56  ;;  %3973 = vmatmul.mubr.msk.f32.vlgmr.msra.gmra.mxu1 %vm439_vm0, %v762_v11 }
 0x2d7   : > { %v3919_v19 = vpop.f32.mrf.mxu1  ;;  %3982 = vmatprep.mubr.msk.f32.mxu1 %vm4468_vm1, %v4467_v49 }
 0x2d8   : > { %v908_v31 = vadd.f32 %v3919_v19, %v791_v51  ;;  %3968 = vmatmul.mubr.msk.f32.vlgmr.msra.gmra.mxu0 %vm439_vm0, %v757_v53 }
 0x2d9   : > { %v902_v54 = vpop.f32.mrf.mxu1  ;;  %3977 = vmatprep.mubr.msk.f32.mxu0 %vm4468_vm1, %v4467_v49 }
 0x2da   : > { %v903_v22 = vadd.f32 %v902_v54, %v791_v51  ;;  %3981 = vmatpush3.xpose.msk.msra.mxu1 %vm439_vm0, %v908_v31 }
 0x2db   : > { %v3903_v23 = vpop.f32.mrf.mxu0  ;;  %3990 = vmatprep.subr.mxu1 %v4467_v49 }
 0x2dc   : > { %v772_v26 = vadd.f32 %v3903_v23, %v655_v56  ;;  %3976 = vmatpush3.xpose.msk.msra.mxu0 %vm439_vm0, %v903_v22 }
 0x2dd   : > { %v766_v30 = vpop.f32.mrf.mxu0  ;;  %3985 = vmatprep.subr.mxu0 %v4467_v49 }
 0x2de   : > { %v767_v37 = vadd.f32 %v766_v30, %v655_v56  ;;  %3983 = vmatmul.mubr.msk.f32.vlgmr.msra.gmra.mxu1 %vm439_vm0, %v772_v26 }
 0x2df   : > { %v3922_v63 = vpop.f32.mrf.mxu1  ;;  %3992 = vmatprep.mubr.msk.f32.mxu1 %vm4468_vm1, %v4467_v49 }
 0x2e0   : > { %v918_v0 = vadd.f32 %v3922_v63, %v791_v51  ;;  %3978 = vmatmul.mubr.msk.f32.vlgmr.msra.gmra.mxu0 %vm439_vm0, %v767_v37 }
 0x2e1   : > { %v912_v38 = vpop.f32.mrf.mxu1  ;;  %3987 = vmatprep.mubr.msk.f32.mxu0 %vm4468_vm1, %v4467_v49 }
 0x2e2   : > { %v913_v39 = vadd.f32 %v912_v38, %v791_v51  ;;  %3991 = vmatpush3.xpose.msk.msra.mxu1 %vm439_vm0, %v918_v0 }
 0x2e3   : > { %v3906_v42 = vpop.f32.mrf.mxu0  ;;  %v3945_v15 = vpop.f32.mrf.mxu1  ;;  %4000 = vmatprep.subr.mxu1 %v4467_v49 }
 0x2e4   : > { %v782_v43 = vadd.f32 %v3906_v42, %v655_v56  ;;  %v1160_v18 = vadd.f32 %v3945_v15, %v4943_v34  ;;  %3986 = vmatpush3.xpose.msk.msra.mxu0 %vm439_vm0, %v913_v39 }
 0x2e5   : > { %v776_v44 = vpop.f32.mrf.mxu0  ;;  %v1154_v35 = vpop.f32.mrf.mxu1  ;;  %3995 = vmatprep.subr.mxu0 %v4467_v49 }
 0x2e6   : > { %v777_v46 = vadd.f32 %v776_v44, %v655_v56  ;;  %3993 = vmatmul.mubr.msk.f32.vlgmr.msra.gmra.mxu1 %vm439_vm0, %v782_v43  ;;  %v1155_v36 = vadd.f32 %v1154_v35, %v4943_v34 }
 0x2e7   : > { %4001 = vmatpush3.msra.mxu1 %v1160_v18  ;;  %4002 = vmatprep.mubr.msk.f32.mxu1 %vm4468_vm1, %v4467_v49  ;;  %v3948_v47 = vpop.f32.mrf.mxu1  ;;  %v4976_v58 = vpop.f32.mrf.mxu0 }
 0x2e8   : > { %3988 = vmatmul.mubr.msk.f32.vlgmr.msra.gmra.mxu0 %vm439_vm0, %v777_v46  ;;  %4010 = vmatprep.subr.mxu1 %v4467_v49  ;;  %v4959_v48 = vadd.f32 %v3948_v47, %v4943_v34 }
 0x2e9   : > { %3996 = vmatpush3.msra.mxu0 %v1155_v36  ;;  %3997 = vmatprep.mubr.msk.f32.mxu0 %vm4468_vm1, %v4467_v49  ;;  %v1164_v60 = vpop.f32.mrf.mxu1  ;;  %v4978_v59 = vpop.f32.mrf.mxu0 }
 0x2ea   : > { %4005 = vmatprep.subr.mxu0 %v4467_v49  ;;  %v4965_v10 = vadd.f32 %v1164_v60, %v4943_v34 }
 0x2eb   : > { %v3951_v51 = vpop.f32.mrf.mxu1  ;;  %v4980_v62 = vpop.f32.mrf.mxu0 }
 0x2ec   : > { %v4968_v52 = vadd.f32 %v3951_v51, %v4943_v34 }
 0x2ed   : > { %v1174_v40 = vpop.f32.mrf.mxu1  ;;  %v4982_v1 = vpop.f32.mrf.mxu0 }
 0x2ee   : > { %v4971_v55 = vadd.f32 %v1174_v40, %v4943_v34 }
 0x2ef   : > { %v3954_v56 = vpop.f32.mrf.mxu1  ;;  %v4984_v41 = vpop.f32.mrf.mxu0 }
 0x2f0   : > { %v4974_v57 = vadd.f32 %v3954_v56, %v4943_v34 }
 0x2f1   : > { %v4986_v2 = vpop.f32.mrf.mxu0  ;;  %v4990_v3 = vpop.f32.mrf.mxu1 }
 0x2f3   : > { %v4988_v45 = vpop.f32.mrf.mxu0 }
 0x2f5   : > { %v4992_v6 = vpop.f32.mrf.mxu0 }
 0x38e   : > { %v4994_v7 = vpop.f32.mrf.mxu1 }
 0x38f   : > { %1833 = vxpose.xlu1.b32.start.end [1/1] (short) (narrow) %v4994_v7, 8  ;;  %v2061_v39 = vsel %vm2057_vm2, %v4994_v7, -inf }
 0x390   : > { %v4997_v11 = vpop.f32.mrf.mxu0  ;;  %v3964_v14 = vpop.f32.mrf.mxu1 }
 0x391   : > { %1801 = vxpose.xlu0.b32.start.end [1/1] (short) (narrow) %v4997_v11, 8  ;;  %v2058_v43 = vsel %vm2057_vm2, %v4997_v11, -inf }
 0x392   : > { %v3959_v53 = vpop.f32.mrf.mxu0 }
 0x396   : > { %v5000_v19 = vpop.f32.mrf.mxu1 }
 0x397   : > { %v2067_v42 = vsel %vm2057_vm2, %v5000_v19, -inf }
 0x398   : > { %v5002_v31 = vpop.f32.mrf.mxu0  ;;  %v3974_v54 = vpop.f32.mrf.mxu1 }
 0x399   : > { %v2064_v15 = vsel %vm2057_vm2, %v5002_v31, -inf }
 0x39a   : > { %v3969_v22 = vpop.f32.mrf.mxu0 }
 0x39e   : > { %v5004_v23 = vpop.f32.mrf.mxu1 }
 0x39f   : > { %v2073_v18 = vsel %vm2057_vm2, %v5004_v23, -inf }
 0x3a0   : > { %v5006_v26 = vpop.f32.mrf.mxu0  ;;  %v3984_v27 = vpop.f32.mrf.mxu1 }
 0x3a1   : > { %v2070_v44 = vsel %vm2057_vm2, %v5006_v26, -inf }
 0x3a2   : > { %v3979_v30 = vpop.f32.mrf.mxu0 }
 0x3a6   : > { %v5008_v37 = vpop.f32.mrf.mxu1 }
 0x3a7   : > { %v2079_v51 = vsel %vm2057_vm2, %v5008_v37, -inf }
 0x3a8   : > { %v5010_v63 = vpop.f32.mrf.mxu0  ;;  %v3994_v0 = vpop.f32.mrf.mxu1 }
 0x3a9   : > { %v2076_v22 = vsel %vm2057_vm2, %v5010_v63, -inf }
 0x3aa   : > { %v3989_v38 = vpop.f32.mrf.mxu0 }
 0x3b6   : > { %2062 = vmax.xlane.f32.xlu1 %v2061_v39 }
 0x3ba   : > { %2068 = vmax.xlane.f32.xlu1 %v2067_v42 }
 0x3be   : > { %2059 = vmax.xlane.f32.xlu0 %v2058_v43  ;;  %2065 = vmax.xlane.f32.xlu1 %v2064_v15 }
 0x3eb   : > { %1897 = vxpose.xlu0.b32.start.end [1/1] (short) (narrow) %v5000_v19, 8 }
 0x3ef   : > { %1865 = vxpose.xlu0.b32.start.end [1/1] (short) (narrow) %v5002_v31, 8 }
 0x3f1   : > { %1961 = vxpose.xlu1.b32.start.end [1/1] (short) (narrow) %v5004_v23, 8 }
 0x3f3   : > { %1929 = vxpose.xlu0.b32.start.end [1/1] (short) (narrow) %v5006_v26, 8 }
 0x40b   : > { %v5030_v46 = vpop.trf.xlu1 }
 0x40c   : > { %v2733_v40 = vsel %vm2057_vm2, %v5030_v46, -inf }
 0x40d   : > { %v5032_v36 = vpop.trf.xlu0 }
 0x40e   : > { %v2730_v30 = vsel %vm2057_vm2, %v5032_v36, -inf }
 0x418   : > { %2074 = vmax.xlane.f32.xlu1 %v2073_v18 }
 0x420   : > { %2071 = vmax.xlane.f32.xlu0 %v2070_v44 }
 0x43f   : > { %v2063_v35 = vpop.xlane.xlu1 %2062 }
 0x440   : > { %v2083_v43 = vsub.f32 %v4994_v7, %v2063_v35 }
 0x442   : > { %v2092_v18 = vmul.f32 1.442695, %v2083_v43 }
 0x443   : > { %v2069_v47 = vpop.xlane.xlu1 %2068 }
 0x444   : > { %v2085_v44 = vsub.f32 %v5000_v19, %v2069_v47  ;;  %4196 = vpow2.f32 %v2092_v18 }
 0x447   : > { %v2060_v60 = vpop.xlane.xlu0 %2059  ;;  %v2066_v56 = vpop.xlane.xlu1 %2065 }
 0x448   : > { %v2082_v15 = vsub.f32 %v4997_v11, %v2060_v60 }
 0x44b   : > { %2025 = vxpose.xlu1.b32.start.end [1/1] (short) (narrow) %v5008_v37, 8 }
 0x44d   : > { %1993 = vxpose.xlu0.b32.start.end [1/1] (short) (narrow) %v5010_v63, 8 }
 0x451   : > { %v5068_v35 = vpop.eup %4196 }
 0x452   : > { %v2109_v60 = vsel %vm2057_vm2, %v5068_v35, 0.0 }
 0x467   : > { %v5038_v14 = vpop.trf.xlu0 }
 0x468   : > { %v2739_v53 = vsel %vm2057_vm2, %v5038_v14, -inf }
 0x46b   : > { %v5046_v27 = vpop.trf.xlu0 }
 0x46c   : > { %v2736_v38 = vsel %vm2057_vm2, %v5046_v27, -inf }
 0x46d   : > { %v5042_v54 = vpop.trf.xlu1 }
 0x46e   : > { %v2745_v0 = vsel %vm2057_vm2, %v5042_v54, -inf }
 0x46f   : > { %v5054_v39 = vpop.trf.xlu0 }
 0x470   : > { %v2742_v42 = vsel %vm2057_vm2, %v5054_v39, -inf }
 0x472   : > { %2080 = vmax.xlane.f32.xlu1 %v2079_v51 }
 0x476   : > { %2734 = vmax.xlane.f32.xlu1 %v2733_v40  ;;  %v2090_v40 = vmul.f32 1.442695, %v2082_v15 }
 0x478   : > { %4198 = vpow2.f32 %v2090_v40 }
 0x47a   : > { %2077 = vmax.xlane.f32.xlu0 %v2076_v22  ;;  %2740 = vmax.xlane.f32.xlu1 %v2739_v53  ;;  %v2084_v53 = vsub.f32 %v5002_v31, %v2066_v56 }
 0x47e   : > { %2731 = vmax.xlane.f32.xlu0 %v2730_v30  ;;  %2746 = vmax.xlane.f32.xlu1 %v2745_v0  ;;  %v2096_v30 = vmul.f32 1.442695, %v2085_v44 }
 0x480   : > { %4200 = vpow2.f32 %v2096_v30 }
 0x482   : > { %2737 = vmax.xlane.f32.xlu0 %v2736_v38  ;;  %v2094_v38 = vmul.f32 1.442695, %v2084_v53 }
 0x484   : > { %4202 = vpow2.f32 %v2094_v38 }
 0x486   : > { %2743 = vmax.xlane.f32.xlu0 %v2742_v42 }
 0x4a1   : > { %v2075_v51 = vpop.xlane.xlu1 %2074 }
 0x4a2   : > { %v2087_v0 = vsub.f32 %v5004_v23, %v2075_v51 }
 0x4a4   : > { %v2100_v7 = vmul.f32 1.442695, %v2087_v0 }
 0x4a6   : > { %4204 = vpow2.f32 %v2100_v7 }
 0x4a9   : > { %v2072_v22 = vpop.xlane.xlu0 %2071 }
 0x4aa   : > { %v2086_v42 = vsub.f32 %v5006_v26, %v2072_v22  ;;  %v5074_v26 = vpop.eup %4198 }
 0x4ab   : > { %v5078_v56 = vpop.eup %4200  ;;  %v2106_v43 = vsel %vm2057_vm2, %v5074_v26, 0.0 }
 0x4ac   : > { %v2098_v11 = vmul.f32 1.442695, %v2086_v42  ;;  %v5082_v15 = vpop.eup %4202  ;;  %v2115_v18 = vsel %vm2057_vm2, %v5078_v56, 0.0 }
 0x4ad   : > { %v2112_v51 = vsel %vm2057_vm2, %v5082_v15, 0.0 }
 0x4ae   : > { %4206 = vpow2.f32 %v2098_v11 }
 0x4b3   : > { %v5086_v44 = vpop.eup %4204 }
 0x4b4   : > { %v2121_v53 = vsel %vm2057_vm2, %v5086_v44, 0.0 }
 0x4bb   : > { %v5090_v40 = vpop.eup %4206 }
 0x4bc   : > { %v2118_v22 = vsel %vm2057_vm2, %v5090_v40, 0.0 }
 0x4c7   : > { %v5064_v19 = vpop.trf.xlu1 }
 0x4c8   : > { %v2751_v31 = vsel %vm2057_vm2, %v5064_v19, -inf }
 0x4c9   : > { %v5070_v47 = vpop.trf.xlu0  ;;  %2752 = vmax.xlane.f32.xlu1 %v2751_v31 }
 0x4ca   : > { %v2748_v23 = vsel %vm2057_vm2, %v5070_v47, -inf }
 0x4cb   : > { %2749 = vmax.xlane.f32.xlu0 %v2748_v23 }
 0x4cd   : > { %2110 = vadd.xlane.f32.xlu1 %v2109_v60 }
 0x4cf   : > { %2107 = vadd.xlane.f32.xlu0 %v2106_v43 }
 0x4d1   : > { %2116 = vadd.xlane.f32.xlu1 %v2115_v18 }
 0x4d3   : > { %2113 = vadd.xlane.f32.xlu0 %v2112_v51 }
 0x4d5   : > { %2122 = vadd.xlane.f32.xlu1 %v2121_v53 }
 0x4d7   : > { %2119 = vadd.xlane.f32.xlu0 %v2118_v22 }
 0x4fb   : > { %v2081_v30 = vpop.xlane.xlu1 %2080 }
 0x4fc   : > { %v2089_v0 = vsub.f32 %v5008_v37, %v2081_v30 }
 0x4fe   : > { %v2104_v38 = vmul.f32 1.442695, %v2089_v0 }
 0x4ff   : > { %v2735_v42 = vpop.xlane.xlu1 %2734 }
 0x500   : > { %4208 = vpow2.f32 %v2104_v38  ;;  %v2755_v7 = vsub.f32 %v5030_v46, %v2735_v42 }
 0x502   : > { %v2764_v11 = vmul.f32 1.442695, %v2755_v7 }
 0x503   : > { %v2078_v31 = vpop.xlane.xlu0 %2077  ;;  %v2741_v23 = vpop.xlane.xlu1 %2740 }
 0x504   : > { %4210 = vpow2.f32 %v2764_v11  ;;  %v2088_v60 = vsub.f32 %v5010_v63, %v2078_v31  ;;  %v2757_v43 = vsub.f32 %v5038_v14, %v2741_v23 }
 0x506   : > { %v2102_v18 = vmul.f32 1.442695, %v2088_v60  ;;  %v2768_v51 = vmul.f32 1.442695, %v2757_v43 }
 0x507   : > { %v2732_v53 = vpop.xlane.xlu0 %2731  ;;  %v2747_v22 = vpop.xlane.xlu1 %2746 }
 0x508   : > { %4212 = vpow2.f32 %v2102_v18  ;;  %v2754_v37 = vsub.f32 %v5032_v36, %v2732_v53  ;;  %v2759_v30 = vsub.f32 %v5042_v54, %v2747_v22 }
 0x509   : > { %4214 = vpow2.f32 %v2768_v51 }
 0x50a   : > { %v2762_v0 = vmul.f32 1.442695, %v2754_v37  ;;  %v2772_v46 = vmul.f32 1.442695, %v2759_v30 }
 0x50b   : > { %v2738_v38 = vpop.xlane.xlu0 %2737 }
 0x50c   : > { %4216 = vpow2.f32 %v2762_v0  ;;  %v2756_v42 = vsub.f32 %v5046_v27, %v2738_v38 }
 0x50d   : > { %v5103_v7 = vpop.eup %4208  ;;  %4218 = vpow2.f32 %v2772_v46 }
 0x50e   : > { %v2766_v63 = vmul.f32 1.442695, %v2756_v42  ;;  %v2127_v14 = vsel %vm2057_vm2, %v5103_v7, 0.0 }
 0x50f   : > { %v2744_v11 = vpop.xlane.xlu0 %2743  ;;  %2128 = vadd.xlane.f32.xlu1 %v2127_v14 }
 0x510   : > { %4220 = vpow2.f32 %v2766_v63  ;;  %v2758_v36 = vsub.f32 %v5054_v39, %v2744_v11 }
 0x511   : > { %v5108_v54 = vpop.eup %4210 }
 0x512   : > { %v2770_v31 = vmul.f32 1.442695, %v2758_v36  ;;  %v2781_v23 = vsel %vm2057_vm2, %v5108_v54, 0.0 }
 0x513   : > { %2782 = vadd.xlane.f32.xlu1 %v2781_v23 }
 0x514   : > { %4222 = vpow2.f32 %v2770_v31 }
 0x515   : > { %v5112_v27 = vpop.eup %4212 }
 0x516   : > { %v5114_v60 = vpop.eup %4214  ;;  %v2124_v43 = vsel %vm2057_vm2, %v5112_v27, 0.0 }
 0x517   : > { %2125 = vadd.xlane.f32.xlu0 %v2124_v43  ;;  %v2787_v18 = vsel %vm2057_vm2, %v5114_v60, 0.0 }
 0x518   : > { %2788 = vadd.xlane.f32.xlu1 %v2787_v18 }
 0x519   : > { %v5120_v39 = vpop.eup %4216 }
 0x51a   : > { %v5122_v51 = vpop.eup %4218  ;;  %v2778_v53 = vsel %vm2057_vm2, %v5120_v39, 0.0 }
 0x51b   : > { %2779 = vadd.xlane.f32.xlu0 %v2778_v53  ;;  %v2793_v22 = vsel %vm2057_vm2, %v5122_v51, 0.0 }
 0x51c   : > { %2794 = vadd.xlane.f32.xlu1 %v2793_v22 }
 0x51d   : > { %v5128_v37 = vpop.eup %4220 }
 0x51e   : > { %v2784_v30 = vsel %vm2057_vm2, %v5128_v37, 0.0 }
 0x51f   : > { %2785 = vadd.xlane.f32.xlu0 %v2784_v30 }
 0x521   : > { %v5132_v0 = vpop.eup %4222 }
 0x522   : > { %v2790_v46 = vsel %vm2057_vm2, %v5132_v0, 0.0 }
 0x523   : > { %2791 = vadd.xlane.f32.xlu0 %v2790_v46 }
 0x552   : > { %v2753_v38 = vpop.xlane.xlu1 %2752 }
 0x553   : > { %v2761_v42 = vsub.f32 %v5064_v19, %v2753_v38 }
 0x554   : > { %v2750_v63 = vpop.xlane.xlu0 %2749 }
 0x555   : > { %v2776_v14 = vmul.f32 1.442695, %v2761_v42  ;;  %v2760_v11 = vsub.f32 %v5070_v47, %v2750_v63 }
 0x556   : > { %v2111_v36 = vpop.xlane.xlu1 %2110 }
 0x557   : > { %4224 = vpow2.f32 %v2776_v14  ;;  %v2774_v31 = vmul.f32 1.442695, %v2760_v11 }
 0x558   : > { %4226 = vrcp.f32 %v2111_v36  ;;  %v2108_v23 = vpop.xlane.xlu0 %2107 }
 0x559   : > { %4228 = vpow2.f32 %v2774_v31 }
 0x55a   : > { %4230 = vrcp.f32 %v2108_v23  ;;  %v2117_v43 = vpop.xlane.xlu1 %2116 }
 0x55b   : > { %4232 = vrcp.f32 %v2117_v43 }
 0x55c   : > { %v2114_v18 = vpop.xlane.xlu0 %2113 }
 0x55d   : > { %4234 = vrcp.f32 %v2114_v18 }
 0x55e   : > { %v2123_v53 = vpop.xlane.xlu1 %2122 }
 0x55f   : > { %4236 = vrcp.f32 %v2123_v53 }
 0x560   : > { %v2120_v22 = vpop.xlane.xlu0 %2119 }
 0x561   : > { %4238 = vrcp.f32 %v2120_v22 }
 0x564   : > { %v5138_v19 = vpop.eup %4224 }
 0x565   : > { %v4227_v30 = vpop.eup %4226  ;;  %v2799_v47 = vsel %vm2057_vm2, %v5138_v19, 0.0 }
 0x566   : > { %v5142_v46 = vpop.eup %4228  ;;  %2800 = vadd.xlane.f32.xlu1 %v2799_v47  ;;  %v2139_v38 = vmul.f32 %v4227_v30, %v5068_v35 }
 0x567   : > { %v4231_v42 = vpop.eup %4230  ;;  %v2796_v63 = vsel %vm2057_vm2, %v5142_v46, 0.0 }
 0x568   : > { %v4233_v14 = vpop.eup %4232  ;;  %4003 = vmatmul.mubr.msk.f32.vlgmr.msra.gmra.mxu1 %vm2057_vm2, %v2139_v38  ;;  %2797 = vadd.xlane.f32.xlu0 %v2796_v63  ;;  %v2138_v11 = vmul.f32 %v4231_v42, %v5074_v26 }
 0x569   : > { %4011 = vmatpush3.msra.mxu1 %v4959_v48  ;;  %4012 = vmatprep.mubr.msk.f32.mxu1 %vm4468_vm1, %v4467_v49  ;;  %v2141_v36 = vmul.f32 %v4233_v14, %v5078_v56 }
 0x56a   : > { %v4235_v31 = vpop.eup %4234  ;;  %3998 = vmatmul.mubr.msk.f32.vlgmr.msra.gmra.mxu0 %vm2057_vm2, %v2138_v11  ;;  %4020 = vmatprep.subr.mxu1 %v4467_v49 }
 0x56b   : > { %4006 = vmatpush3.msra.mxu0 %v4965_v10  ;;  %4007 = vmatprep.mubr.msk.f32.mxu0 %vm4468_vm1, %v4467_v49  ;;  %v2140_v35 = vmul.f32 %v4235_v31, %v5082_v15 }
 0x56c   : > { %v4237_v26 = vpop.eup %4236  ;;  %4013 = vmatmul.mubr.msk.f32.vlgmr.msra.gmra.mxu1 %vm2057_vm2, %v2141_v36  ;;  %4015 = vmatprep.subr.mxu0 %v4467_v49 }
 0x56d   : > { %4021 = vmatpush3.msra.mxu1 %v4968_v52  ;;  %4022 = vmatprep.mubr.msk.f32.mxu1 %vm4468_vm1, %v4467_v49  ;;  %v2143_v48 = vmul.f32 %v4237_v26, %v5086_v44  ;;  %v1185_v52 = vadd.f32 %v4990_v3, %v4943_v34  ;;  %v926_v34 = vsub.s32 2, %v4902_v61 }
 0x56e   : > { %v4239_v56 = vpop.eup %4238  ;;  %4008 = vmatmul.mubr.msk.f32.vlgmr.msra.gmra.mxu0 %vm2057_vm2, %v2140_v35  ;;  %4030 = vmatprep.subr.mxu1 %v4467_v49 }
 0x56f   : > { %4016 = vmatpush3.msra.mxu0 %v4971_v55  ;;  %4017 = vmatprep.mubr.msk.f32.mxu0 %vm4468_vm1, %v4467_v49  ;;  %v2142_v10 = vmul.f32 %v4239_v56, %v5090_v40  ;;  %v927_v44 = vrot.slane %v4908_v50, %v926_v34 }
 0x570   : > { %4023 = vmatmul.mubr.msk.f32.vlgmr.msra.gmra.mxu1 %vm2057_vm2, %v2143_v48  ;;  %4025 = vmatprep.subr.mxu0 %v4467_v49 }
 0x571   : > { %4031 = vmatpush3.msra.mxu1 %v4974_v57  ;;  %4032 = vmatprep.mubr.msk.f32.mxu1 %vm4468_vm1, %v4467_v49  ;;  %v1024_v53 = vadd.f32 %v4976_v58, %v927_v44  ;;  %v1034_v30 = vadd.f32 %v4980_v62, %v927_v44  ;;  %v1019_v42 = vadd.f32 %v4978_v59, %v927_v44 }
 0x572   : > { %4018 = vmatmul.mubr.msk.f32.vlgmr.msra.gmra.mxu0 %vm2057_vm2, %v2142_v10  ;;  %4040 = vmatprep.subr.mxu1 %v4467_v49  ;;  %v1044_v62 = vadd.f32 %v4984_v41, %v927_v44  ;;  %v1054_v41 = vadd.f32 %v4988_v45, %v927_v44  ;;  %v5241_v10 = vld [vmem:[%s370_s11] ss:$0 sm:$0xff] }
 0x573   : > { %4026 = vmatpush3.msra.mxu0 %v1185_v52  ;;  %4027 = vmatprep.mubr.msk.f32.mxu0 %vm4468_vm1, %v4467_v49 }
 0x574   : > { %4035 = vmatprep.subr.mxu0 %v4467_v49 }
 0x598   : > { %v2129_v55 = vpop.xlane.xlu1 %2128 }
 0x599   : > { %4240 = vrcp.f32 %v2129_v55 }
 0x59c   : > { %v2783_v15 = vpop.xlane.xlu1 %2782 }
 0x59d   : > { %4242 = vrcp.f32 %v2783_v15 }
 0x5a0   : > { %v2126_v57 = vpop.xlane.xlu0 %2125 }
 0x5a1   : > { %4244 = vrcp.f32 %v2126_v57  ;;  %v2789_v3 = vpop.xlane.xlu1 %2788 }
 0x5a2   : > { %4246 = vrcp.f32 %v2789_v3 }
 0x5a4   : > { %v2780_v40 = vpop.xlane.xlu0 %2779 }
 0x5a5   : > { %4248 = vrcp.f32 %v2780_v40  ;;  %v2795_v23 = vpop.xlane.xlu1 %2794 }
 0x5a6   : > { %v4241_v43 = vpop.eup %4240  ;;  %4250 = vrcp.f32 %v2795_v23 }
 0x5a7   : > { %v2145_v18 = vmul.f32 %v4241_v43, %v5103_v7 }
 0x5a8   : > { %v2786_v22 = vpop.xlane.xlu0 %2785 }
 0x5a9   : > { %4252 = vrcp.f32 %v2786_v22  ;;  %4033 = vmatmul.mubr.msk.f32.vlgmr.msra.gmra.mxu1 %vm2057_vm2, %v2145_v18 }
 0x5aa   : > { %v4243_v61 = vpop.eup %4242  ;;  %4041 = vmatpush3.msra.mxu1 %v1024_v53  ;;  %4042 = vmatprep.mubr.msk.f32.mxu1 %vm4468_vm1, %v4467_v49 }
 0x5ab   : > { %4050 = vmatprep.subr.mxu1 %v4467_v49  ;;  %v2811_v50 = vmul.f32 %v4243_v61, %v5108_v54 }
 0x5ac   : > { %v2792_v47 = vpop.xlane.xlu0 %2791 }
 0x5ad   : > { %4254 = vrcp.f32 %v2792_v47  ;;  %4043 = vmatmul.mubr.msk.f32.vlgmr.msra.gmra.mxu1 %vm2057_vm2, %v2811_v50 }
 0x5ae   : > { %v4245_v58 = vpop.eup %4244  ;;  %4051 = vmatpush3.msra.mxu1 %v1034_v30  ;;  %4052 = vmatprep.mubr.msk.f32.mxu1 %vm4468_vm1, %v4467_v49 }
 0x5af   : > { %v4247_v7 = vpop.eup %4246  ;;  %4060 = vmatprep.subr.mxu1 %v4467_v49  ;;  %v2144_v38 = vmul.f32 %v4245_v58, %v5112_v27  ;;  %v1029_v27 = vadd.f32 %v4982_v1, %v927_v44 }
 0x5b0   : > { %v2813_v54 = vmul.f32 %v4247_v7, %v5114_v60 }
 0x5b1   : > { %4028 = vmatmul.mubr.msk.f32.vlgmr.msra.gmra.mxu0 %vm2057_vm2, %v2144_v38 }
 0x5b2   : > { %v4249_v63 = vpop.eup %4248  ;;  %4036 = vmatpush3.msra.mxu0 %v1019_v42  ;;  %4053 = vmatmul.mubr.msk.f32.vlgmr.msra.gmra.mxu1 %vm2057_vm2, %v2813_v54 }
 0x5b3   : > { %v4251_v14 = vpop.eup %4250  ;;  %4061 = vmatpush3.msra.mxu1 %v1044_v62  ;;  %4037 = vmatprep.mubr.msk.f32.mxu0 %vm4468_vm1, %v4467_v49  ;;  %v2810_v11 = vmul.f32 %v4249_v63, %v5120_v39  ;;  %v1039_v39 = vadd.f32 %v4986_v2, %v927_v44  ;;  %v1049_v2 = vadd.f32 %v4992_v6, %v927_v44 }
 0x5b4   : > { %4045 = vmatprep.subr.mxu0 %v4467_v49  ;;  %4062 = vmatprep.mubr.msk.f32.mxu1 %vm4468_vm1, %v4467_v49  ;;  %v2815_v59 = vmul.f32 %v4251_v14, %v5122_v51 }
 0x5b5   : > { %4070 = vmatprep.subr.mxu1 %v4467_v49  ;;  %4038 = vmatmul.mubr.msk.f32.vlgmr.msra.gmra.mxu0 %vm2057_vm2, %v2810_v11 }
 0x5b6   : > { %v4253_v60 = vpop.eup %4252  ;;  %4046 = vmatpush3.msra.mxu0 %v1029_v27  ;;  %4063 = vmatmul.mubr.msk.f32.vlgmr.msra.gmra.mxu1 %vm2057_vm2, %v2815_v59 }
 0x5b7   : > { %4071 = vmatpush3.msra.mxu1 %v1054_v41  ;;  %4047 = vmatprep.mubr.msk.f32.mxu0 %vm4468_vm1, %v4467_v49  ;;  %v2812_v1 = vmul.f32 %v4253_v60, %v5128_v37 }
 0x5b8   : > { %4055 = vmatprep.subr.mxu0 %v4467_v49  ;;  %4072 = vmatprep.mubr.msk.f32.mxu1 %vm4468_vm1, %v4467_v49 }
 0x5b9   : > { %4048 = vmatmul.mubr.msk.f32.vlgmr.msra.gmra.mxu0 %vm2057_vm2, %v2812_v1 }
 0x5ba   : > { %v4255_v45 = vpop.eup %4254  ;;  %4056 = vmatpush3.msra.mxu0 %v1039_v39  ;;  %4057 = vmatprep.mubr.msk.f32.mxu0 %vm4468_vm1, %v4467_v49 }
 0x5bb   : > { %4065 = vmatprep.subr.mxu0 %v4467_v49  ;;  %v2814_v51 = vmul.f32 %v4255_v45, %v5132_v0 }
 0x5bd   : > { %4058 = vmatmul.mubr.msk.f32.vlgmr.msra.gmra.mxu0 %vm2057_vm2, %v2814_v51 }
 0x5be   : > { %4066 = vmatpush3.msra.mxu0 %v1049_v2  ;;  %4067 = vmatprep.mubr.msk.f32.mxu0 %vm4468_vm1, %v4467_v49 }
 0x5ef   : > { %v2801_v37 = vpop.xlane.xlu1 %2800 }
 0x5f0   : > { %4256 = vrcp.f32 %v2801_v37 }
 0x5f1   : > { %v2798_v36 = vpop.xlane.xlu0 %2797 }
 0x5f2   : > { %4258 = vrcp.f32 %v2798_v36 }
 0x5fd   : > { %v4257_v31 = vpop.eup %4256 }
 0x5fe   : > { %v2817_v35 = vmul.f32 %v4257_v31, %v5138_v19 }
 0x5ff   : > { %v4259_v26 = vpop.eup %4258 }
 0x600   : > { %4073 = vmatmul.mubr.msk.f32.vlgmr.msra.gmra.mxu1 %vm2057_vm2, %v2817_v35  ;;  %v2816_v0 = vmul.f32 %v4259_v26, %v5142_v46 }
 0x602   : > { %4068 = vmatmul.mubr.msk.f32.vlgmr.msra.gmra.mxu0 %vm2057_vm2, %v2816_v0 }
 0x628   : > { %v2288_v6 = vpop.f32.mrf.mxu1 }
 0x629   : > { %v3404_v55 = vadd.f32 %v2288_v6, %v4674_v9 }
 0x62a   : > { %v2215_v49 = vpop.f32.mrf.mxu0  ;;  %v4004_v48 = vpop.f32.mrf.mxu1 }
 0x62b   : > { %v3403_v56 = vadd.f32 %v2215_v49, %v4666_v5  ;;  %v3418_v44 = vadd.f32 %v5241_v10, %v3404_v55 }
 0x62c   : > { %v3999_v19 = vpop.f32.mrf.mxu0  ;;  %v2434_v52 = vpop.f32.mrf.mxu1 }
 0x62d   : > { %v3417_v46 = vadd.f32 %v5241_v10, %v3403_v56  ;;  %v3406_v18 = vadd.f32 %v2434_v52, %v4690_v17 }
 0x62e   : > { %v2361_v15 = vpop.f32.mrf.mxu0  ;;  %v4014_v34 = vpop.f32.mrf.mxu1 }
 0x62f   : > { %3425 = vxpose.xlu0.b32.start [1/8] (short) (narrow) %v3417_v46, 16  ;;  %v3405_v40 = vadd.f32 %v2361_v15, %v4682_v13  ;;  %v3420_v9 = vadd.f32 %v5241_v10, %v3406_v18 }
 0x630   : > { %v4009_v57 = vpop.f32.mrf.mxu0  ;;  %v2580_v3 = vpop.f32.mrf.mxu1 }
 0x631   : > { %v3419_v53 = vadd.f32 %v5241_v10, %v3405_v40  ;;  %v3408_v61 = vadd.f32 %v2580_v3, %v4706_v25 }
 0x632   : > { %v2507_v23 = vpop.f32.mrf.mxu0  ;;  %v4024_v43 = vpop.f32.mrf.mxu1 }
 0x633   : > { %3426 = vxpose.xlu0.b32.cont [2/8] (short) (narrow) %v3418_v44, 16  ;;  %v3407_v22 = vadd.f32 %v2507_v23, %v4698_v21  ;;  %v3422_v13 = vadd.f32 %v5241_v10, %v3408_v61 }
 0x634   : > { %v4019_v5 = vpop.f32.mrf.mxu0 }
 0x635   : > { %v3421_v50 = vadd.f32 %v5241_v10, %v3407_v22 }
 0x637   : > { %3427 = vxpose.xlu0.b32.cont [3/8] (short) (narrow) %v3419_v53, 16 }
 0x63b   : > { %3428 = vxpose.xlu0.b32.cont [4/8] (short) (narrow) %v3420_v9, 16 }
 0x63f   : > { %3429 = vxpose.xlu0.b32.cont [5/8] (short) (narrow) %v3421_v50, 16 }
 0x643   : > { %3430 = vxpose.xlu0.b32.cont [6/8] (short) (narrow) %v3422_v13, 16 }
 0x669   : > { %v2726_v30 = vpop.f32.mrf.mxu1 }
 0x66a   : > { %v3410_v21 = vadd.f32 %v2726_v30, %v4722_v33 }
 0x66b   : > { %v4034_v47 = vpop.f32.mrf.mxu1 }
 0x66c   : > { %v3424_v59 = vadd.f32 %v5241_v10, %v3410_v21 }
 0x66d   : > { %v2960_v58 = vpop.f32.mrf.mxu1 }
 0x66e   : > { %v3461_v41 = vadd.f32 %v2960_v58, %v4672_v8 }
 0x66f   : > { %v4044_v17 = vpop.f32.mrf.mxu1 }
 0x670   : > { %v3469_v39 = vadd.f32 %v5241_v10, %v3461_v41 }
 0x671   : > { %v2653_v7 = vpop.f32.mrf.mxu0 }
 0x672   : > { %v3409_v38 = vadd.f32 %v2653_v7, %v4714_v29  ;;  %v3106_v42 = vpop.f32.mrf.mxu1 }
 0x673   : > { %v4029_v54 = vpop.f32.mrf.mxu0  ;;  %v3463_v2 = vadd.f32 %v3106_v42, %v4688_v16 }
 0x674   : > { %v3423_v62 = vadd.f32 %v5241_v10, %v3409_v38  ;;  %v4054_v25 = vpop.f32.mrf.mxu1 }
 0x675   : > { %v2887_v63 = vpop.f32.mrf.mxu0  ;;  %v3471_v8 = vadd.f32 %v5241_v10, %v3463_v2 }
 0x676   : > { %v3460_v14 = vadd.f32 %v2887_v63, %v4664_v4  ;;  %v3252_v11 = vpop.f32.mrf.mxu1  ;;  %3431 = vxpose.xlu0.b32.cont [7/8] (short) (narrow) %v3423_v62, 16 }
 0x677   : > { %v4039_v27 = vpop.f32.mrf.mxu0  ;;  %v3465_v31 = vadd.f32 %v3252_v11, %v4704_v24 }
 0x678   : > { %v3468_v60 = vadd.f32 %v5241_v10, %v3460_v14  ;;  %v4064_v29 = vpop.f32.mrf.mxu1 }
 0x679   : > { %v3033_v1 = vpop.f32.mrf.mxu0 }
 0x67a   : > { %3476 = vxpose.xlu1.b32.start [1/8] (short) (narrow) %v3468_v60, 16  ;;  %3432 = vxpose.xlu0.b32.end [8/8] (short) (narrow) %v3424_v59, 16  ;;  %v3462_v45 = vadd.f32 %v3033_v1, %v4680_v12  ;;  %v3473_v12 = vadd.f32 %v5241_v10, %v3465_v31 }
 0x67b   : > { %v4049_v33 = vpop.f32.mrf.mxu0 }
 0x67c   : > { %v3470_v37 = vadd.f32 %v5241_v10, %v3462_v45 }
 0x67d   : > { %v3179_v51 = vpop.f32.mrf.mxu0 }
 0x67e   : > { %3477 = vxpose.xlu1.b32.cont [2/8] (short) (narrow) %v3469_v39, 16  ;;  %v3464_v36 = vadd.f32 %v3179_v51, %v4696_v20 }
 0x67f   : > { %v4059_v4 = vpop.f32.mrf.mxu0 }
 0x680   : > { %v3472_v35 = vadd.f32 %v5241_v10, %v3464_v36 }
 0x682   : > { %3478 = vxpose.xlu1.b32.cont [3/8] (short) (narrow) %v3470_v37, 16 }
 0x686   : > { %3479 = vxpose.xlu1.b32.cont [4/8] (short) (narrow) %v3471_v8, 16 }
 0x68a   : > { %3480 = vxpose.xlu1.b32.cont [5/8] (short) (narrow) %v3472_v35, 16 }
 0x68e   : > { %3481 = vxpose.xlu1.b32.cont [6/8] (short) (narrow) %v3473_v12, 16 }
 0x6c0   : > { %v3398_v26 = vpop.f32.mrf.mxu1 }
 0x6c1   : > { %v3467_v20 = vadd.f32 %v3398_v26, %v4720_v32 }
 0x6c2   : > { %v3325_v16 = vpop.f32.mrf.mxu0  ;;  %v4074_v0 = vpop.f32.mrf.mxu1 }
 0x6c3   : > { %v3466_v6 = vadd.f32 %v3325_v16, %v4712_v28  ;;  %v3475_v48 = vadd.f32 %v5241_v10, %v3467_v20 }
 0x6c4   : > { %v4069_v49 = vpop.f32.mrf.mxu0 }
 0x6c5   : > { %v3474_v24 = vadd.f32 %v5241_v10, %v3466_v6 }
 0x6c7   : > { %3482 = vxpose.xlu1.b32.cont [7/8] (short) (narrow) %v3474_v24, 16 }
 0x6cb   : > { %3483 = vxpose.xlu1.b32.end [8/8] (short) (narrow) %v3475_v48, 16 }
 0x6da   : > { %v3441_v56 = vpop.trf.xlu0 }
 0x6db   : > { %3458 = vst.msk [vmem:[%s360_s28] sm:$0xff] %vm3457_vm3, %v3441_v56 }
 0x6de   : > { %v3442_v28 = vpop.trf.xlu0 }
 0x6df   : > { %3459 = vst.msk [vmem:[%s360_s28 + $0x8] sm:$0xff] %vm3457_vm3, %v3442_v28 }
 0x6e0   : > { %4355 = shalt.err (!%p4352_p2)
}
 0x6e1   : > { %s4356_s27 = scalar_lea.hbm %s5284_s13, 256  ;;  %s4360_s15 = scalar_lea.hbm %s5377_s5, 512 }
 0x6e2   : > { %p4357_p6 = scmp.ne.s32.totalorder %s5284_s13, %s4356_s27  ;;  %p4361_p13 = scmp.lt.s32.totalorder %s5284_s13, %s5377_s5 }
 0x6e3   : > { %p4362_p3 = scmp.lt.s32.totalorder %s4360_s15, %s4356_s27 }
 0x6e4   : > { %p4358_p9 = pnand %p4357_p6, %p4594_p0 }
 0x6e5   : > { %p4363_p1 = por %p4362_p3, %p4361_p13 }
 0x6e6   : > { %p4359_p12 = pneg %p4358_p9 }
 0x6e8   : > { %p4364_p4 = pnand %p4363_p1, %p4359_p12 }
 0x6ea   : > { %4367 = shalt.err (!%p4364_p4)
}
 0x6eb   : > { %s4470_s28 = smov 128   ;;  %s4471_s20 = smov 8  }
 0x6ec   : > { %4083 = dma.vmem_to_hbm [thread:$0]  (%p4594_p0), %s5276_s8, 256, %s5284_s13, %s3511_s16, %s4470_s28, %s4470_s28, %s4471_s20  }
 0x6ed   : > { %s367_s12 = scalar_lea.vmem [#allocation9], %s4646_s9  ;;  %s5322_s7 = scalar_lea.hbm %s5378_s6, %s3801_s10 }
 0x6ee   : > { %s3547_s18 = sshll.u32 %s367_s12, 4  ;;  %s3516_s8 = scalar_lea.sflag [#allocation10], %s4643_s14  ;;  %s5315_s18 = int_to_ptr.vmem [resolvable:$true] %s3547_s18 }
 0x6ef   : > { %s4368_s9 = scalar_lea.vmem %s5315_s18, 256  ;;  %s4472_s13 = smov [#allocation9]  }
 0x6f0   : > { %p4369_p8 = scmp.ne.s32.totalorder %s5315_s18, %s4368_s9  ;;  %s4372_s16 = sshll.u32 %s4472_s13, 4  ;;  %s4373_s16 = int_to_ptr.vmem [resolvable:$false] %s4372_s16 }
 0x6f1   : > { %s4374_s24 = scalar_lea.vmem %s4373_s16, 512  ;;  %p4375_p7 = scmp.lt.s32.totalorder %s5315_s18, %s4373_s16 }
 0x6f2   : > { %p4370_p10 = pnand %p4369_p8, %p4594_p0  ;;  %p4376_p11 = scmp.lt.s32.totalorder %s4374_s24, %s4368_s9 }
 0x6f4   : > { %p4371_p5 = pneg %p4370_p10  ;;  %p4377_p2 = por %p4376_p11, %p4375_p7 }
 0x6f6   : > { %p4378_p6 = pnand %p4377_p2, %p4371_p5 }
 0x72b   : > { %v3492_v32 = vpop.trf.xlu1 }
 0x72c   : > { %3508 = vst.msk [vmem:[%s367_s12] sm:$0xff] %vm3457_vm3, %v3492_v32 }
 0x72f   : > { %v3493_v10 = vpop.trf.xlu1 }
 0x730   : > { %3509 = vst.msk [vmem:[%s367_s12 + $0x8] sm:$0xff] %vm3457_vm3, %v3493_v10 }
 0x731   : > { %4381 = shalt.err (!%p4378_p6)
}
 0x732   : > { %s4382_s10 = scalar_lea.hbm %s5322_s7, 256  ;;  %s4386_s29 = scalar_lea.hbm %s5378_s6, 512 }
 0x733   : > { %p4383_p9 = scmp.ne.s32.totalorder %s5322_s7, %s4382_s10  ;;  %p4387_p3 = scmp.lt.s32.totalorder %s5322_s7, %s5378_s6 }
 0x734   : > { %p4388_p1 = scmp.lt.s32.totalorder %s4386_s29, %s4382_s10 }
 0x735   : > { %p4384_p12 = pnand %p4383_p9, %p4594_p0 }
 0x736   : > { %p4389_p4 = por %p4388_p1, %p4387_p3 }
 0x737   : > { %p4385_p13 = pneg %p4384_p12 }
 0x739   : > { %p4390_p8 = pnand %p4389_p4, %p4385_p13 }
 0x73b   : > { %4393 = shalt.err (!%p4390_p8)
}
 0x73c   : > { %4084 = dma.vmem_to_hbm [thread:$0]  (%p4594_p0), %s5315_s18, 256, %s5322_s7, %s3516_s8, %s4470_s28, %s4470_s28, %s4471_s20  }
 0x73d PF: > { %s5402_s30 = sld [smem:[#allocation17_spill]]  ;;  %s3562_s11 = sand.u32 1, %s4440_s21  }
 0x73e   : > { %p5404_p5 = scmp.ge.s32.totalorder %s4460_s26, 2  ;;  %s3563_s12 = scalar_lea.sflag [#allocation4], %s3562_s11 }
 0x743   : > { %p5403_p10 = scmp.ne.s32.totalorder %s5402_s30, 0 }
 0x745   : > { %p4099_p7 = pnand %p5404_p5, %p5403_p10 }
 0x747   : > { %p4100_p11 = pneg %p4099_p7 }
 0x749   : > { %4431 = dma.done.wait (%p4100_p11), %s3563_s12, 256  }
 0x74a   : > { %4433 = vsyncadd (%p4100_p11), %s3563_s12, 4294967040  ;;  %s3572_s3 = scalar_lea.sflag [#allocation10], %s3562_s11 }
 0x74b   : > { %4435 = dma.done.wait (%p4100_p11), %s3572_s3, 256  }
 0x74c   : > { %4437 = vsyncadd (%p4100_p11), %s3572_s3, 4294967040  ;;  %s29_s26 = sadd.s32 1, %s4460_s26   ;;  %s5405_s19 = sld [smem:[#allocation19_spill]] }
 0x74d   : > { %p26_p2 = scmp.ge.s32.totalorder %s29_s26, 4   ;;  %s5406_s24 = sld [smem:[#allocation16_spill]] }
 0x74e   : > { %s5407_s25 = sld [smem:[#allocation18_spill]]  ;;  %s5408_s21 = smov %s4444_s22 }
 0x74f   : > { %s5409_s22 = smov %s4448_s23  ;;  %28 = sbr.rel (!%p26_p2) target bundleno = 12 (0xc), region = 125 }
 0x752   : > { %s5410_s23 = smov %s5405_s19 }
 0x754   :  { %3577 = vsyncpa [#allocation3], 1 }
 0x755   :  { %3579 = vsyncpa [#allocation3 + $0x1], 1 }
 0x756   :  { %3580 = vsyncpa [#allocation6], 1 }
 0x757   :  { %3582 = vsyncpa [#allocation6 + $0x1], 1 }
 0x758   :  { %3583 = vsyncpa [#allocation4], 1 }
 0x759   :  { %3585 = vsyncpa [#allocation4 + $0x1], 1 }
 0x75a   :  { %3586 = vsyncpa [#allocation10], 1 }
 0x75b   :  { %3588 = vsyncpa [#allocation10 + $0x1], 1 }

</bundles_post_ra>
